<compile_context>
chip_gen: v5e
topology: v5e:2x2
jax: 0.10.0
libtpu: 0.0.40
codegen_flags: <defaults>
</compile_context>

<pallas_src>
import functools

import jax
import jax.numpy as jnp
import numpy as np
from jax.experimental import pallas as pl
from jax.experimental.pallas import tpu as pltpu


def _round_up(a, m):
    return ((a + m - 1) // m) * m


def block_kernel(
    x_ref,                      # (Np, C)   f32  whole (padded) sequence, this batch elem
    rpb_ref,                    # (H, tq, Np) f32  rel_pos_bias rows of this q tile
    wq_ref, wk_ref, wv_ref,     # (H, C, Dh) bf16  (softmax scale folded into wq)
    wo_ref,                     # (H, Dh, C) bf16
    w1_ref,                     # (C, Hm)    bf16
    w2_ref,                     # (Hm, C)    bf16
    ln1w_ref, ln1b_ref,         # (1, C) f32
    qb_ref, vb_ref,             # (H, 1, Dh) f32   (scale folded into qb)
    bo_ref,                     # (1, C) f32
    ln2w_ref, ln2b_ref,         # (1, C) f32
    b1_ref,                     # (1, Hm) f32
    b2_ref,                     # (1, C) f32
    g1_ref, g2_ref,             # (1, C) f32
    xout_ref, fc_ref,           # (tq, C) outputs
    k_s, v_s,                   # (H, Np, Dh) bf16 scratch, persistent across q tiles
    *, num_heads, tq, eps,
):
    t = pl.program_id(1)
    Np, C = x_ref.shape

    def layernorm(v, w, b):
        mu = jnp.mean(v, axis=-1, keepdims=True)
        var = jnp.mean((v - mu) ** 2, axis=-1, keepdims=True)
        return (v - mu) * jax.lax.rsqrt(var + eps) * w + b

    # ---- K / V for the full sequence: computed once per batch element (q tile 0) ----
    @pl.when(t == 0)
    def _():
        xf = x_ref[...].astype(jnp.float32)                             # (Np, C)
        ln1_full = layernorm(xf, ln1w_ref[...], ln1b_ref[...]).astype(jnp.bfloat16)
        for h in range(num_heads):
            k_s[h] = jnp.dot(
                ln1_full, wk_ref[h], preferred_element_type=jnp.float32
            ).astype(jnp.bfloat16)
            v_s[h] = (
                jnp.dot(ln1_full, wv_ref[h], preferred_element_type=jnp.float32)
                + vb_ref[h]
            ).astype(jnp.bfloat16)

    # ---- this query tile ----
    row0 = pl.multiple_of(t * tq, tq)
    xt = x_ref[pl.ds(row0, tq), :].astype(jnp.float32)                  # (tq, C)
    ln1t = layernorm(xt, ln1w_ref[...], ln1b_ref[...]).astype(jnp.bfloat16)

    # Attention: per-head projection / softmax / AV, projection accumulated per head
    # (no fused 3C tensor, no lane slicing, no concat).
    attn_out = jnp.zeros((tq, C), jnp.float32)
    for h in range(num_heads):
        qh = (
            jnp.dot(ln1t, wq_ref[h], preferred_element_type=jnp.float32)
            + qb_ref[h]
        )                                                               # (tq, Dh) f32
        s = jax.lax.dot_general(
            qh.astype(jnp.bfloat16), k_s[h],
            (((1,), (1,)), ((), ())),
            preferred_element_type=jnp.float32,
        )                                                               # (tq, Np) f32
        s = s + rpb_ref[h].astype(jnp.float32)
        s = s - jnp.max(s, axis=-1, keepdims=True)
        p = jnp.exp(s)
        p = p * pl.reciprocal(jnp.sum(p, axis=-1, keepdims=True), approx=True)
        oh = jnp.dot(p.astype(jnp.bfloat16), v_s[h],
                     preferred_element_type=jnp.float32)                # (tq, Dh)
        attn_out = attn_out + jnp.dot(
            oh.astype(jnp.bfloat16), wo_ref[h],
            preferred_element_type=jnp.float32,
        )                                                               # (tq, C)
    attn_out = attn_out + bo_ref[...]
    x1 = xt + g1_ref[...] * attn_out                                    # residual + layer scale

    # ---- MLP branch ----
    ln2t = layernorm(x1, ln2w_ref[...], ln2b_ref[...]).astype(jnp.bfloat16)
    hdn = jnp.dot(ln2t, w1_ref[...], preferred_element_type=jnp.float32) + b1_ref[...]
    # exact (erf-based) GELU, matching torch.nn.GELU()
    hdn = 0.5 * hdn * (1.0 + jax.lax.erf(hdn * jnp.float32(0.7071067811865476)))
    fc = jnp.dot(hdn.astype(jnp.bfloat16), w2_ref[...],
                 preferred_element_type=jnp.float32) + b2_ref[...]
    fc = g2_ref[...] * fc                                               # layer scale

    xout_ref[...] = (x1 + fc).astype(xout_ref.dtype)
    fc_ref[...] = fc.astype(fc_ref.dtype)


def block_forward(x, rel_pos_bias, params, *, num_heads, eps=1e-5, q_tile=256):
    """x: (B, N, C) f32, rel_pos_bias: (H, N, N) f32. Returns (x_out, fc_feature)."""
    B, N, C = x.shape
    H = num_heads
    assert C % H == 0
    Dh = C // H
    scale = Dh ** -0.5
    f32, bf16 = jnp.float32, jnp.bfloat16

    # ---- sequence tiling / padding (q tile multiple of 8, Np multiple of tq) ----
    tq = min(q_tile, _round_up(N, 8))
    tq = _round_up(tq, 8)
    Np = _round_up(N, tq)
    T = Np // tq

    if Np != N:
        xp = jnp.pad(x, ((0, 0), (0, Np - N), (0, 0)))
        # Pad rel_pos_bias with a large negative so padded keys get ~0 softmax weight.
        rpb_p = jnp.pad(rel_pos_bias, ((0, 0), (0, Np - N), (0, Np - N)),
                        constant_values=-1e9)
    else:
        xp, rpb_p = x, rel_pos_bias

    # ---- weight preprocessing: (in, out) layout, per-head split, bf16, scale folded ----
    wqkv = params["wqkv"]                              # (3C, C), PyTorch (out, in)
    Wq, Wk, Wv = wqkv[:C], wqkv[C:2 * C], wqkv[2 * C:]
    wq = (Wq.reshape(H, Dh, C).transpose(0, 2, 1) * scale).astype(bf16)   # (H, C, Dh)
    wk = Wk.reshape(H, Dh, C).transpose(0, 2, 1).astype(bf16)             # (H, C, Dh)
    wv = Wv.reshape(H, Dh, C).transpose(0, 2, 1).astype(bf16)             # (H, C, Dh)
    qb = (params["q_bias"].reshape(H, 1, Dh) * scale).astype(f32)         # (H, 1, Dh)
    vb = params["v_bias"].reshape(H, 1, Dh).astype(f32)                   # (H, 1, Dh)
    wo = params["wproj"].T.reshape(H, Dh, C).astype(bf16)                 # (H, Dh, C)
    bo = params["bproj"].astype(f32)                                      # (1, C)
    w1 = params["w1"].T.astype(bf16)                                      # (C, Hm)
    b1 = params["b1"].astype(f32)                                         # (1, Hm)
    w2 = params["w2"].T.astype(bf16)                                      # (Hm, C)
    b2 = params["b2"].astype(f32)                                         # (1, C)

    kernel = functools.partial(block_kernel, num_heads=H, tq=tq, eps=eps)

    # grid-invariant operands: whole array, single-buffered, resident in VMEM
    vmem_spec = pl.BlockSpec(memory_space=pltpu.MemorySpace.VMEM)
    x_spec = pl.BlockSpec((None, Np, C), lambda b, t: (b, 0, 0))
    rpb_spec = pl.BlockSpec((H, tq, Np), lambda b, t: (0, t, 0))
    out_spec = pl.BlockSpec((None, tq, C), lambda b, t: (b, t, 0))

    out_shapes = (
        jax.ShapeDtypeStruct((B, Np, C), x.dtype),
        jax.ShapeDtypeStruct((B, Np, C), x.dtype),
    )

    x_out, fc = pl.pallas_call(
        kernel,
        out_shape=out_shapes,
        grid=(B, T),
        in_specs=[x_spec, rpb_spec] + [vmem_spec] * 17,
        out_specs=(out_spec, out_spec),
        scratch_shapes=[
            pltpu.VMEM((H, Np, Dh), jnp.bfloat16),   # K for all heads / keys
            pltpu.VMEM((H, Np, Dh), jnp.bfloat16),   # V for all heads / keys
        ],
        compiler_params=pltpu.CompilerParams(
            dimension_semantics=("parallel", "arbitrary"),
            vmem_limit_bytes=64 * 1024 * 1024,
        ),
    )(
        xp, rpb_p,
        wq, wk, wv, wo, w1, w2,
        params["ln1_w"].astype(f32), params["ln1_b"].astype(f32),
        qb, vb, bo,
        params["ln2_w"].astype(f32), params["ln2_b"].astype(f32),
        b1, b2,
        params["gamma_1"].astype(f32), params["gamma_2"].astype(f32),
    )

    if Np != N:
        x_out = x_out[:, :N]
        fc = fc[:, :N]
    return x_out, fc


def block_reference(x, rel_pos_bias, params, *, num_heads, eps=1e-5):
    """Pure-JAX f32 reference mirroring the PyTorch forward (eval mode)."""
    B, N, C = x.shape
    head_dim = C // num_heads

    def ln(v, w, b):
        mu = v.mean(-1, keepdims=True)
        var = ((v - mu) ** 2).mean(-1, keepdims=True)
        return (v - mu) / jnp.sqrt(var + eps) * w[0] + b[0]

    ln1 = ln(x, params["ln1_w"], params["ln1_b"])
    qkv_bias = jnp.concatenate(
        [params["q_bias"][0], jnp.zeros((C,), x.dtype), params["v_bias"][0]]
    )
    qkv = ln1 @ params["wqkv"].T + qkv_bias                       # (B, N, 3C)
    qkv = qkv.reshape(B, N, 3, num_heads, head_dim).transpose(2, 0, 3, 1, 4)
    q, k, v = qkv[0], qkv[1], qkv[2]
    q = q * (head_dim ** -0.5)
    attn = jnp.einsum("bhqd,bhkd->bhqk", q, k) + rel_pos_bias[None]
    attn = jax.nn.softmax(attn, axis=-1)
    out = jnp.einsum("bhqk,bhkd->bhqd", attn, v).transpose(0, 2, 1, 3).reshape(B, N, C)
    out = out @ params["wproj"].T + params["bproj"][0]
    x1 = x + params["gamma_1"][0] * out

    ln2 = ln(x1, params["ln2_w"], params["ln2_b"])
    h = ln2 @ params["w1"].T + params["b1"][0]
    h = jax.nn.gelu(h, approximate=False)
    fc = (h @ params["w2"].T + params["b2"][0]) * params["gamma_2"][0]
    return x1 + fc, fc


if __name__ == "__main__":
    # Small shapes consistent with the module: dim=64, num_heads=4, mlp_ratio=4, seq=12.
    B, N, C = 2, 12, 64
    num_heads = 4
    mlp_hidden = int(C * 4.0)
    init_values = 0.1

    key = jax.random.PRNGKey(0)
    keys = jax.random.split(key, 16)

    params = {
        "ln1_w": 1.0 + 0.05 * jax.random.normal(keys[11], (1, C), jnp.float32),
        "ln1_b": 0.05 * jax.random.normal(keys[12], (1, C), jnp.float32),
        "wqkv": 0.02 * jax.random.normal(keys[0], (3 * C, C), jnp.float32),
        "q_bias": 0.02 * jax.random.normal(keys[1], (1, C), jnp.float32),
        "v_bias": 0.02 * jax.random.normal(keys[2], (1, C), jnp.float32),
        "wproj": 0.02 * jax.random.normal(keys[3], (C, C), jnp.float32),
        "bproj": 0.02 * jax.random.normal(keys[4], (1, C), jnp.float32),
        "ln2_w": 1.0 + 0.05 * jax.random.normal(keys[13], (1, C), jnp.float32),
        "ln2_b": 0.05 * jax.random.normal(keys[14], (1, C), jnp.float32),
        "w1": 0.02 * jax.random.normal(keys[5], (mlp_hidden, C), jnp.float32),
        "b1": 0.02 * jax.random.normal(keys[6], (1, mlp_hidden), jnp.float32),
        "w2": 0.02 * jax.random.normal(keys[7], (C, mlp_hidden), jnp.float32),
        "b2": 0.02 * jax.random.normal(keys[8], (1, C), jnp.float32),
        "gamma_1": init_values * jnp.ones((1, C), jnp.float32),
        "gamma_2": init_values * jnp.ones((1, C), jnp.float32),
    }

    x = jax.random.normal(keys[9], (B, N, C), jnp.float32)
    rel_pos_bias = 0.1 * jax.random.normal(keys[10], (num_heads, N, N), jnp.float32)

    x_ref_out, fc_ref_out = block_reference(x, rel_pos_bias, params, num_heads=num_heads)

    # Multi-tile path: N=12 padded to 16, two query tiles of 8 (exercises padding + K/V reuse).
    x_out, fc_out = block_forward(x, rel_pos_bias, params, num_heads=num_heads, q_tile=8)
    jax.block_until_ready((x_out, fc_out))
    np.testing.assert_allclose(np.asarray(x_out), np.asarray(x_ref_out), atol=1e-2, rtol=1e-2)
    np.testing.assert_allclose(np.asarray(fc_out), np.asarray(fc_ref_out), atol=1e-2, rtol=1e-2)

    # Single-tile path (default q_tile).
    x_out2, fc_out2 = block_forward(x, rel_pos_bias, params, num_heads=num_heads)
    jax.block_until_ready((x_out2, fc_out2))
    np.testing.assert_allclose(np.asarray(x_out2), np.asarray(x_ref_out), atol=1e-2, rtol=1e-2)
    np.testing.assert_allclose(np.asarray(fc_out2), np.asarray(fc_ref_out), atol=1e-2, rtol=1e-2)

    print("KERNEL_OK")
</pallas_src>

<mosaic_0001>
module attributes {stable_mosaic.version = 11 : i64} {
  func.func @block_kernel(%arg0: i32, %arg1: i32, %arg2: memref<1x16x64xf32, #tpu.memory_space<vmem>>, %arg3: memref<4x8x16xf32, #tpu.memory_space<vmem>>, %arg4: memref<4x64x16xbf16, #tpu.memory_space<vmem>>, %arg5: memref<4x64x16xbf16, #tpu.memory_space<vmem>>, %arg6: memref<4x64x16xbf16, #tpu.memory_space<vmem>>, %arg7: memref<4x16x64xbf16, #tpu.memory_space<vmem>>, %arg8: memref<64x256xbf16, #tpu.memory_space<vmem>>, %arg9: memref<256x64xbf16, #tpu.memory_space<vmem>>, %arg10: memref<1x64xf32, #tpu.memory_space<vmem>>, %arg11: memref<1x64xf32, #tpu.memory_space<vmem>>, %arg12: memref<4x1x16xf32, #tpu.memory_space<vmem>>, %arg13: memref<4x1x16xf32, #tpu.memory_space<vmem>>, %arg14: memref<1x64xf32, #tpu.memory_space<vmem>>, %arg15: memref<1x64xf32, #tpu.memory_space<vmem>>, %arg16: memref<1x64xf32, #tpu.memory_space<vmem>>, %arg17: memref<1x256xf32, #tpu.memory_space<vmem>>, %arg18: memref<1x64xf32, #tpu.memory_space<vmem>>, %arg19: memref<1x64xf32, #tpu.memory_space<vmem>>, %arg20: memref<1x64xf32, #tpu.memory_space<vmem>>, %arg21: memref<1x8x64xf32, #tpu.memory_space<vmem>>, %arg22: memref<1x8x64xf32, #tpu.memory_space<vmem>>, %arg23: memref<4x16x16xbf16, #tpu.memory_space<vmem>>, %arg24: memref<4x16x16xbf16, #tpu.memory_space<vmem>>) attributes {dimension_semantics = [#tpu.dimension_semantics<parallel>, #tpu.dimension_semantics<arbitrary>], iteration_bounds = array<i64: 2, 2>, scalar_prefetch = 0 : i64, scratch_operands = 2 : i64, tpu.core_type = #tpu.core_type<tc>, window_params = [{transform_indices = @transform_0, window_bounds = array<i64: 1, 16, 64>}, {transform_indices = @transform_1, window_bounds = array<i64: 4, 8, 16>}, {pipeline_mode = #tpu.pipeline_mode<synchronous>, transform_indices = @transform_2, window_bounds = array<i64: 4, 64, 16>}, {pipeline_mode = #tpu.pipeline_mode<synchronous>, transform_indices = @transform_3, window_bounds = array<i64: 4, 64, 16>}, {pipeline_mode = #tpu.pipeline_mode<synchronous>, transform_indices = @transform_4, window_bounds = array<i64: 4, 64, 16>}, {pipeline_mode = #tpu.pipeline_mode<synchronous>, transform_indices = @transform_5, window_bounds = array<i64: 4, 16, 64>}, {pipeline_mode = #tpu.pipeline_mode<synchronous>, transform_indices = @transform_6, window_bounds = array<i64: 64, 256>}, {pipeline_mode = #tpu.pipeline_mode<synchronous>, transform_indices = @transform_7, window_bounds = array<i64: 256, 64>}, {pipeline_mode = #tpu.pipeline_mode<synchronous>, transform_indices = @transform_8, window_bounds = array<i64: 1, 64>}, {pipeline_mode = #tpu.pipeline_mode<synchronous>, transform_indices = @transform_9, window_bounds = array<i64: 1, 64>}, {pipeline_mode = #tpu.pipeline_mode<synchronous>, transform_indices = @transform_10, window_bounds = array<i64: 4, 1, 16>}, {pipeline_mode = #tpu.pipeline_mode<synchronous>, transform_indices = @transform_11, window_bounds = array<i64: 4, 1, 16>}, {pipeline_mode = #tpu.pipeline_mode<synchronous>, transform_indices = @transform_12, window_bounds = array<i64: 1, 64>}, {pipeline_mode = #tpu.pipeline_mode<synchronous>, transform_indices = @transform_13, window_bounds = array<i64: 1, 64>}, {pipeline_mode = #tpu.pipeline_mode<synchronous>, transform_indices = @transform_14, window_bounds = array<i64: 1, 64>}, {pipeline_mode = #tpu.pipeline_mode<synchronous>, transform_indices = @transform_15, window_bounds = array<i64: 1, 256>}, {pipeline_mode = #tpu.pipeline_mode<synchronous>, transform_indices = @transform_16, window_bounds = array<i64: 1, 64>}, {pipeline_mode = #tpu.pipeline_mode<synchronous>, transform_indices = @transform_17, window_bounds = array<i64: 1, 64>}, {pipeline_mode = #tpu.pipeline_mode<synchronous>, transform_indices = @transform_18, window_bounds = array<i64: 1, 64>}, {transform_indices = @transform_19, window_bounds = array<i64: 1, 8, 64>}, {transform_indices = @transform_20, window_bounds = array<i64: 1, 8, 64>}]} {
    %c0_i32 = arith.constant 0 : i32
    %0 = arith.cmpi eq, %arg1, %c0_i32 : i32
    %1 = arith.extui %0 : i1 to i32
    %c0_i32_0 = arith.constant 0 : i32
    %2 = arith.cmpi ne, %1, %c0_i32_0 : i32
    scf.if %2 {
      %c0_138 = arith.constant 0 : index
      %c0_139 = arith.constant 0 : index
      %c0_140 = arith.constant 0 : index
      %227 = vector.load %arg2[%c0_138, %c0_139, %c0_140] : memref<1x16x64xf32, #tpu.memory_space<vmem>>, vector<1x16x64xf32>
      %228 = vector.shape_cast %227 : vector<1x16x64xf32> to vector<16x64xf32>
      %c0_141 = arith.constant 0 : index
      %c0_142 = arith.constant 0 : index
      %229 = vector.load %arg10[%c0_141, %c0_142] : memref<1x64xf32, #tpu.memory_space<vmem>>, vector<1x64xf32>
      %c0_143 = arith.constant 0 : index
      %c0_144 = arith.constant 0 : index
      %230 = vector.load %arg11[%c0_143, %c0_144] : memref<1x64xf32, #tpu.memory_space<vmem>>, vector<1x64xf32>
      %cst_145 = arith.constant dense<0.000000e+00> : vector<16xf32>
      %231 = vector.multi_reduction <add>, %228, %cst_145 [1] : vector<16x64xf32> to vector<16xf32>
      %232 = vector.shape_cast %231 : vector<16xf32> to vector<16x1xf32>
      %cst_146 = arith.constant 6.400000e+01 : f32
      %233 = vector.broadcast %cst_146 : f32 to vector<16x1xf32>
      %234 = arith.divf %232, %233 : vector<16x1xf32>
      %235 = vector.broadcast %234 : vector<16x1xf32> to vector<16x64xf32>
      %236 = arith.subf %228, %235 : vector<16x64xf32>
      %237 = arith.mulf %236, %236 : vector<16x64xf32>
      %cst_147 = arith.constant dense<0.000000e+00> : vector<16xf32>
      %238 = vector.multi_reduction <add>, %237, %cst_147 [1] : vector<16x64xf32> to vector<16xf32>
      %239 = vector.shape_cast %238 : vector<16xf32> to vector<16x1xf32>
      %cst_148 = arith.constant 6.400000e+01 : f32
      %240 = vector.broadcast %cst_148 : f32 to vector<16x1xf32>
      %241 = arith.divf %239, %240 : vector<16x1xf32>
      %242 = vector.broadcast %234 : vector<16x1xf32> to vector<16x64xf32>
      %243 = arith.subf %228, %242 : vector<16x64xf32>
      %cst_149 = arith.constant 9.99999974E-6 : f32
      %244 = vector.broadcast %cst_149 : f32 to vector<16x1xf32>
      %245 = arith.addf %241, %244 : vector<16x1xf32>
      %246 = math.rsqrt %245 : vector<16x1xf32>
      %247 = vector.broadcast %246 : vector<16x1xf32> to vector<16x64xf32>
      %248 = arith.mulf %243, %247 : vector<16x64xf32>
      %249 = vector.broadcast %229 : vector<1x64xf32> to vector<16x64xf32>
      %250 = arith.mulf %248, %249 : vector<16x64xf32>
      %251 = vector.broadcast %230 : vector<1x64xf32> to vector<16x64xf32>
      %252 = arith.addf %250, %251 : vector<16x64xf32>
      %253 = arith.truncf %252 : vector<16x64xf32> to vector<16x64xbf16>
      %c0_150 = arith.constant 0 : index
      %c0_151 = arith.constant 0 : index
      %c0_152 = arith.constant 0 : index
      %254 = vector.load %arg5[%c0_150, %c0_151, %c0_152] : memref<4x64x16xbf16, #tpu.memory_space<vmem>>, vector<1x64x16xbf16>
      %255 = vector.shape_cast %254 : vector<1x64x16xbf16> to vector<64x16xbf16>
      %cst_153 = arith.constant dense<0.000000e+00> : vector<16x16xf32>
      %256 = tpu.matmul %253, %255, %cst_153 {dimension_numbers = #tpu.dot_dimension_numbers<[1], [0], [0], [1], [0, 0, 1, 1], [], []>} : vector<16x64xbf16>, vector<64x16xbf16>, vector<16x16xf32> -> vector<16x16xf32>
      %257 = arith.truncf %256 : vector<16x16xf32> to vector<16x16xbf16>
      %c0_154 = arith.constant 0 : index
      %c0_155 = arith.constant 0 : index
      %c0_156 = arith.constant 0 : index
      %258 = vector.load %arg23[%c0_154, %c0_155, %c0_156] : memref<4x16x16xbf16, #tpu.memory_space<vmem>>, vector<1x16x16xbf16>
      %259 = vector.shape_cast %258 : vector<1x16x16xbf16> to vector<16x16xbf16>
      %260 = vector.shape_cast %257 : vector<16x16xbf16> to vector<1x16x16xbf16>
      tpu.vector_store %arg23[%c0_154, %c0_155, %c0_156], %260 {strides = array<i32>} : memref<4x16x16xbf16, #tpu.memory_space<vmem>>, vector<1x16x16xbf16>,
      %c0_157 = arith.constant 0 : index
      %c0_158 = arith.constant 0 : index
      %c0_159 = arith.constant 0 : index
      %261 = vector.load %arg6[%c0_157, %c0_158, %c0_159] : memref<4x64x16xbf16, #tpu.memory_space<vmem>>, vector<1x64x16xbf16>
      %262 = vector.shape_cast %261 : vector<1x64x16xbf16> to vector<64x16xbf16>
      %cst_160 = arith.constant dense<0.000000e+00> : vector<16x16xf32>
      %263 = tpu.matmul %253, %262, %cst_160 {dimension_numbers = #tpu.dot_dimension_numbers<[1], [0], [0], [1], [0, 0, 1, 1], [], []>} : vector<16x64xbf16>, vector<64x16xbf16>, vector<16x16xf32> -> vector<16x16xf32>
      %c0_161 = arith.constant 0 : index
      %c0_162 = arith.constant 0 : index
      %c0_163 = arith.constant 0 : index
      %264 = vector.load %arg13[%c0_161, %c0_162, %c0_163] : memref<4x1x16xf32, #tpu.memory_space<vmem>>, vector<1x1x16xf32>
      %265 = vector.shape_cast %264 : vector<1x1x16xf32> to vector<1x16xf32>
      %266 = vector.broadcast %265 : vector<1x16xf32> to vector<16x16xf32>
      %267 = arith.addf %263, %266 : vector<16x16xf32>
      %268 = arith.truncf %267 : vector<16x16xf32> to vector<16x16xbf16>
      %c0_164 = arith.constant 0 : index
      %c0_165 = arith.constant 0 : index
      %c0_166 = arith.constant 0 : index
      %269 = vector.load %arg24[%c0_164, %c0_165, %c0_166] : memref<4x16x16xbf16, #tpu.memory_space<vmem>>, vector<1x16x16xbf16>
      %270 = vector.shape_cast %269 : vector<1x16x16xbf16> to vector<16x16xbf16>
      %271 = vector.shape_cast %268 : vector<16x16xbf16> to vector<1x16x16xbf16>
      tpu.vector_store %arg24[%c0_164, %c0_165, %c0_166], %271 {strides = array<i32>} : memref<4x16x16xbf16, #tpu.memory_space<vmem>>, vector<1x16x16xbf16>,
      %c1_167 = arith.constant 1 : index
      %c0_168 = arith.constant 0 : index
      %c0_169 = arith.constant 0 : index
      %272 = vector.load %arg5[%c1_167, %c0_168, %c0_169] : memref<4x64x16xbf16, #tpu.memory_space<vmem>>, vector<1x64x16xbf16>
      %273 = vector.shape_cast %272 : vector<1x64x16xbf16> to vector<64x16xbf16>
      %cst_170 = arith.constant dense<0.000000e+00> : vector<16x16xf32>
      %274 = tpu.matmul %253, %273, %cst_170 {dimension_numbers = #tpu.dot_dimension_numbers<[1], [0], [0], [1], [0, 0, 1, 1], [], []>} : vector<16x64xbf16>, vector<64x16xbf16>, vector<16x16xf32> -> vector<16x16xf32>
      %275 = arith.truncf %274 : vector<16x16xf32> to vector<16x16xbf16>
      %c1_171 = arith.constant 1 : index
      %c0_172 = arith.constant 0 : index
      %c0_173 = arith.constant 0 : index
      %276 = vector.load %arg23[%c1_171, %c0_172, %c0_173] : memref<4x16x16xbf16, #tpu.memory_space<vmem>>, vector<1x16x16xbf16>
      %277 = vector.shape_cast %276 : vector<1x16x16xbf16> to vector<16x16xbf16>
      %278 = vector.shape_cast %275 : vector<16x16xbf16> to vector<1x16x16xbf16>
      tpu.vector_store %arg23[%c1_171, %c0_172, %c0_173], %278 {strides = array<i32>} : memref<4x16x16xbf16, #tpu.memory_space<vmem>>, vector<1x16x16xbf16>,
      %c1_174 = arith.constant 1 : index
      %c0_175 = arith.constant 0 : index
      %c0_176 = arith.constant 0 : index
      %279 = vector.load %arg6[%c1_174, %c0_175, %c0_176] : memref<4x64x16xbf16, #tpu.memory_space<vmem>>, vector<1x64x16xbf16>
      %280 = vector.shape_cast %279 : vector<1x64x16xbf16> to vector<64x16xbf16>
      %cst_177 = arith.constant dense<0.000000e+00> : vector<16x16xf32>
      %281 = tpu.matmul %253, %280, %cst_177 {dimension_numbers = #tpu.dot_dimension_numbers<[1], [0], [0], [1], [0, 0, 1, 1], [], []>} : vector<16x64xbf16>, vector<64x16xbf16>, vector<16x16xf32> -> vector<16x16xf32>
      %c1_178 = arith.constant 1 : index
      %c0_179 = arith.constant 0 : index
      %c0_180 = arith.constant 0 : index
      %282 = vector.load %arg13[%c1_178, %c0_179, %c0_180] : memref<4x1x16xf32, #tpu.memory_space<vmem>>, vector<1x1x16xf32>
      %283 = vector.shape_cast %282 : vector<1x1x16xf32> to vector<1x16xf32>
      %284 = vector.broadcast %283 : vector<1x16xf32> to vector<16x16xf32>
      %285 = arith.addf %281, %284 : vector<16x16xf32>
      %286 = arith.truncf %285 : vector<16x16xf32> to vector<16x16xbf16>
      %c1_181 = arith.constant 1 : index
      %c0_182 = arith.constant 0 : index
      %c0_183 = arith.constant 0 : index
      %287 = vector.load %arg24[%c1_181, %c0_182, %c0_183] : memref<4x16x16xbf16, #tpu.memory_space<vmem>>, vector<1x16x16xbf16>
      %288 = vector.shape_cast %287 : vector<1x16x16xbf16> to vector<16x16xbf16>
      %289 = vector.shape_cast %286 : vector<16x16xbf16> to vector<1x16x16xbf16>
      tpu.vector_store %arg24[%c1_181, %c0_182, %c0_183], %289 {strides = array<i32>} : memref<4x16x16xbf16, #tpu.memory_space<vmem>>, vector<1x16x16xbf16>,
      %c2_184 = arith.constant 2 : index
      %c0_185 = arith.constant 0 : index
      %c0_186 = arith.constant 0 : index
      %290 = vector.load %arg5[%c2_184, %c0_185, %c0_186] : memref<4x64x16xbf16, #tpu.memory_space<vmem>>, vector<1x64x16xbf16>
      %291 = vector.shape_cast %290 : vector<1x64x16xbf16> to vector<64x16xbf16>
      %cst_187 = arith.constant dense<0.000000e+00> : vector<16x16xf32>
      %292 = tpu.matmul %253, %291, %cst_187 {dimension_numbers = #tpu.dot_dimension_numbers<[1], [0], [0], [1], [0, 0, 1, 1], [], []>} : vector<16x64xbf16>, vector<64x16xbf16>, vector<16x16xf32> -> vector<16x16xf32>
      %293 = arith.truncf %292 : vector<16x16xf32> to vector<16x16xbf16>
      %c2_188 = arith.constant 2 : index
      %c0_189 = arith.constant 0 : index
      %c0_190 = arith.constant 0 : index
      %294 = vector.load %arg23[%c2_188, %c0_189, %c0_190] : memref<4x16x16xbf16, #tpu.memory_space<vmem>>, vector<1x16x16xbf16>
      %295 = vector.shape_cast %294 : vector<1x16x16xbf16> to vector<16x16xbf16>
      %296 = vector.shape_cast %293 : vector<16x16xbf16> to vector<1x16x16xbf16>
      tpu.vector_store %arg23[%c2_188, %c0_189, %c0_190], %296 {strides = array<i32>} : memref<4x16x16xbf16, #tpu.memory_space<vmem>>, vector<1x16x16xbf16>,
      %c2_191 = arith.constant 2 : index
      %c0_192 = arith.constant 0 : index
      %c0_193 = arith.constant 0 : index
      %297 = vector.load %arg6[%c2_191, %c0_192, %c0_193] : memref<4x64x16xbf16, #tpu.memory_space<vmem>>, vector<1x64x16xbf16>
      %298 = vector.shape_cast %297 : vector<1x64x16xbf16> to vector<64x16xbf16>
      %cst_194 = arith.constant dense<0.000000e+00> : vector<16x16xf32>
      %299 = tpu.matmul %253, %298, %cst_194 {dimension_numbers = #tpu.dot_dimension_numbers<[1], [0], [0], [1], [0, 0, 1, 1], [], []>} : vector<16x64xbf16>, vector<64x16xbf16>, vector<16x16xf32> -> vector<16x16xf32>
      %c2_195 = arith.constant 2 : index
      %c0_196 = arith.constant 0 : index
      %c0_197 = arith.constant 0 : index
      %300 = vector.load %arg13[%c2_195, %c0_196, %c0_197] : memref<4x1x16xf32, #tpu.memory_space<vmem>>, vector<1x1x16xf32>
      %301 = vector.shape_cast %300 : vector<1x1x16xf32> to vector<1x16xf32>
      %302 = vector.broadcast %301 : vector<1x16xf32> to vector<16x16xf32>
      %303 = arith.addf %299, %302 : vector<16x16xf32>
      %304 = arith.truncf %303 : vector<16x16xf32> to vector<16x16xbf16>
      %c2_198 = arith.constant 2 : index
      %c0_199 = arith.constant 0 : index
      %c0_200 = arith.constant 0 : index
      %305 = vector.load %arg24[%c2_198, %c0_199, %c0_200] : memref<4x16x16xbf16, #tpu.memory_space<vmem>>, vector<1x16x16xbf16>
      %306 = vector.shape_cast %305 : vector<1x16x16xbf16> to vector<16x16xbf16>
      %307 = vector.shape_cast %304 : vector<16x16xbf16> to vector<1x16x16xbf16>
      tpu.vector_store %arg24[%c2_198, %c0_199, %c0_200], %307 {strides = array<i32>} : memref<4x16x16xbf16, #tpu.memory_space<vmem>>, vector<1x16x16xbf16>,
      %c3_201 = arith.constant 3 : index
      %c0_202 = arith.constant 0 : index
      %c0_203 = arith.constant 0 : index
      %308 = vector.load %arg5[%c3_201, %c0_202, %c0_203] : memref<4x64x16xbf16, #tpu.memory_space<vmem>>, vector<1x64x16xbf16>
      %309 = vector.shape_cast %308 : vector<1x64x16xbf16> to vector<64x16xbf16>
      %cst_204 = arith.constant dense<0.000000e+00> : vector<16x16xf32>
      %310 = tpu.matmul %253, %309, %cst_204 {dimension_numbers = #tpu.dot_dimension_numbers<[1], [0], [0], [1], [0, 0, 1, 1], [], []>} : vector<16x64xbf16>, vector<64x16xbf16>, vector<16x16xf32> -> vector<16x16xf32>
      %311 = arith.truncf %310 : vector<16x16xf32> to vector<16x16xbf16>
      %c3_205 = arith.constant 3 : index
      %c0_206 = arith.constant 0 : index
      %c0_207 = arith.constant 0 : index
      %312 = vector.load %arg23[%c3_205, %c0_206, %c0_207] : memref<4x16x16xbf16, #tpu.memory_space<vmem>>, vector<1x16x16xbf16>
      %313 = vector.shape_cast %312 : vector<1x16x16xbf16> to vector<16x16xbf16>
      %314 = vector.shape_cast %311 : vector<16x16xbf16> to vector<1x16x16xbf16>
      tpu.vector_store %arg23[%c3_205, %c0_206, %c0_207], %314 {strides = array<i32>} : memref<4x16x16xbf16, #tpu.memory_space<vmem>>, vector<1x16x16xbf16>,
      %c3_208 = arith.constant 3 : index
      %c0_209 = arith.constant 0 : index
      %c0_210 = arith.constant 0 : index
      %315 = vector.load %arg6[%c3_208, %c0_209, %c0_210] : memref<4x64x16xbf16, #tpu.memory_space<vmem>>, vector<1x64x16xbf16>
      %316 = vector.shape_cast %315 : vector<1x64x16xbf16> to vector<64x16xbf16>
      %cst_211 = arith.constant dense<0.000000e+00> : vector<16x16xf32>
      %317 = tpu.matmul %253, %316, %cst_211 {dimension_numbers = #tpu.dot_dimension_numbers<[1], [0], [0], [1], [0, 0, 1, 1], [], []>} : vector<16x64xbf16>, vector<64x16xbf16>, vector<16x16xf32> -> vector<16x16xf32>
      %c3_212 = arith.constant 3 : index
      %c0_213 = arith.constant 0 : index
      %c0_214 = arith.constant 0 : index
      %318 = vector.load %arg13[%c3_212, %c0_213, %c0_214] : memref<4x1x16xf32, #tpu.memory_space<vmem>>, vector<1x1x16xf32>
      %319 = vector.shape_cast %318 : vector<1x1x16xf32> to vector<1x16xf32>
      %320 = vector.broadcast %319 : vector<1x16xf32> to vector<16x16xf32>
      %321 = arith.addf %317, %320 : vector<16x16xf32>
      %322 = arith.truncf %321 : vector<16x16xf32> to vector<16x16xbf16>
      %c3_215 = arith.constant 3 : index
      %c0_216 = arith.constant 0 : index
      %c0_217 = arith.constant 0 : index
      %323 = vector.load %arg24[%c3_215, %c0_216, %c0_217] : memref<4x16x16xbf16, #tpu.memory_space<vmem>>, vector<1x16x16xbf16>
      %324 = vector.shape_cast %323 : vector<1x16x16xbf16> to vector<16x16xbf16>
      %325 = vector.shape_cast %322 : vector<16x16xbf16> to vector<1x16x16xbf16>
      tpu.vector_store %arg24[%c3_215, %c0_216, %c0_217], %325 {strides = array<i32>} : memref<4x16x16xbf16, #tpu.memory_space<vmem>>, vector<1x16x16xbf16>,
    } else {
    }
    %c8_i32 = arith.constant 8 : i32
    %3 = arith.muli %arg1, %c8_i32 : i32
    %4 = tpu.assume_multiple %3, 8 : i32
    %c0 = arith.constant 0 : index
    %5 = arith.index_cast %4 : i32 to index
    %c0_1 = arith.constant 0 : index
    %6 = vector.load %arg2[%c0, %5, %c0_1] : memref<1x16x64xf32, #tpu.memory_space<vmem>>, vector<1x8x64xf32>
    %7 = vector.shape_cast %6 : vector<1x8x64xf32> to vector<8x64xf32>
    %c0_2 = arith.constant 0 : index
    %c0_3 = arith.constant 0 : index
    %8 = vector.load %arg10[%c0_2, %c0_3] : memref<1x64xf32, #tpu.memory_space<vmem>>, vector<1x64xf32>
    %c0_4 = arith.constant 0 : index
    %c0_5 = arith.constant 0 : index
    %9 = vector.load %arg11[%c0_4, %c0_5] : memref<1x64xf32, #tpu.memory_space<vmem>>, vector<1x64xf32>
    %cst = arith.constant dense<0.000000e+00> : vector<8xf32>
    %10 = vector.multi_reduction <add>, %7, %cst [1] : vector<8x64xf32> to vector<8xf32>
    %11 = vector.shape_cast %10 : vector<8xf32> to vector<8x1xf32>
    %cst_6 = arith.constant 6.400000e+01 : f32
    %12 = vector.broadcast %cst_6 : f32 to vector<8x1xf32>
    %13 = arith.divf %11, %12 : vector<8x1xf32>
    %14 = vector.broadcast %13 : vector<8x1xf32> to vector<8x64xf32>
    %15 = arith.subf %7, %14 : vector<8x64xf32>
    %16 = arith.mulf %15, %15 : vector<8x64xf32>
    %cst_7 = arith.constant dense<0.000000e+00> : vector<8xf32>
    %17 = vector.multi_reduction <add>, %16, %cst_7 [1] : vector<8x64xf32> to vector<8xf32>
    %18 = vector.shape_cast %17 : vector<8xf32> to vector<8x1xf32>
    %cst_8 = arith.constant 6.400000e+01 : f32
    %19 = vector.broadcast %cst_8 : f32 to vector<8x1xf32>
    %20 = arith.divf %18, %19 : vector<8x1xf32>
    %21 = vector.broadcast %13 : vector<8x1xf32> to vector<8x64xf32>
    %22 = arith.subf %7, %21 : vector<8x64xf32>
    %cst_9 = arith.constant 9.99999974E-6 : f32
    %23 = vector.broadcast %cst_9 : f32 to vector<8x1xf32>
    %24 = arith.addf %20, %23 : vector<8x1xf32>
    %25 = math.rsqrt %24 : vector<8x1xf32>
    %26 = vector.broadcast %25 : vector<8x1xf32> to vector<8x64xf32>
    %27 = arith.mulf %22, %26 : vector<8x64xf32>
    %28 = vector.broadcast %8 : vector<1x64xf32> to vector<8x64xf32>
    %29 = arith.mulf %27, %28 : vector<8x64xf32>
    %30 = vector.broadcast %9 : vector<1x64xf32> to vector<8x64xf32>
    %31 = arith.addf %29, %30 : vector<8x64xf32>
    %32 = arith.truncf %31 : vector<8x64xf32> to vector<8x64xbf16>
    %cst_10 = arith.constant 0.000000e+00 : f32
    %33 = vector.broadcast %cst_10 : f32 to vector<8x64xf32>
    %c0_11 = arith.constant 0 : index
    %c0_12 = arith.constant 0 : index
    %c0_13 = arith.constant 0 : index
    %34 = vector.load %arg4[%c0_11, %c0_12, %c0_13] : memref<4x64x16xbf16, #tpu.memory_space<vmem>>, vector<1x64x16xbf16>
    %35 = vector.shape_cast %34 : vector<1x64x16xbf16> to vector<64x16xbf16>
    %cst_14 = arith.constant dense<0.000000e+00> : vector<8x16xf32>
    %36 = tpu.matmul %32, %35, %cst_14 {dimension_numbers = #tpu.dot_dimension_numbers<[1], [0], [0], [1], [0, 0, 1, 1], [], []>} : vector<8x64xbf16>, vector<64x16xbf16>, vector<8x16xf32> -> vector<8x16xf32>
    %c0_15 = arith.constant 0 : index
    %c0_16 = arith.constant 0 : index
    %c0_17 = arith.constant 0 : index
    %37 = vector.load %arg12[%c0_15, %c0_16, %c0_17] : memref<4x1x16xf32, #tpu.memory_space<vmem>>, vector<1x1x16xf32>
    %38 = vector.shape_cast %37 : vector<1x1x16xf32> to vector<1x16xf32>
    %39 = vector.broadcast %38 : vector<1x16xf32> to vector<8x16xf32>
    %40 = arith.addf %36, %39 : vector<8x16xf32>
    %41 = arith.truncf %40 : vector<8x16xf32> to vector<8x16xbf16>
    %c0_18 = arith.constant 0 : index
    %c0_19 = arith.constant 0 : index
    %c0_20 = arith.constant 0 : index
    %42 = vector.load %arg23[%c0_18, %c0_19, %c0_20] : memref<4x16x16xbf16, #tpu.memory_space<vmem>>, vector<1x16x16xbf16>
    %43 = vector.shape_cast %42 : vector<1x16x16xbf16> to vector<16x16xbf16>
    %cst_21 = arith.constant dense<0.000000e+00> : vector<8x16xf32>
    %44 = tpu.matmul %41, %43, %cst_21 {dimension_numbers = #tpu.dot_dimension_numbers<[1], [1], [0], [0], [0, 0, 1, 0], [], []>} : vector<8x16xbf16>, vector<16x16xbf16>, vector<8x16xf32> -> vector<8x16xf32>
    %c0_22 = arith.constant 0 : index
    %c0_23 = arith.constant 0 : index
    %c0_24 = arith.constant 0 : index
    %45 = vector.load %arg3[%c0_22, %c0_23, %c0_24] : memref<4x8x16xf32, #tpu.memory_space<vmem>>, vector<1x8x16xf32>
    %46 = vector.shape_cast %45 : vector<1x8x16xf32> to vector<8x16xf32>
    %47 = arith.addf %44, %46 : vector<8x16xf32>
    %cst_25 = arith.constant dense<0xFF800000> : vector<8xf32>
    %48 = vector.multi_reduction <maximumf>, %47, %cst_25 [1] : vector<8x16xf32> to vector<8xf32>
    %49 = vector.shape_cast %48 : vector<8xf32> to vector<8x1xf32>
    %50 = vector.broadcast %49 : vector<8x1xf32> to vector<8x16xf32>
    %51 = arith.subf %47, %50 : vector<8x16xf32>
    %52 = math.exp %51 : vector<8x16xf32>
    %cst_26 = arith.constant dense<0.000000e+00> : vector<8xf32>
    %53 = vector.multi_reduction <add>, %52, %cst_26 [1] : vector<8x16xf32> to vector<8xf32>
    %54 = vector.shape_cast %53 : vector<8xf32> to vector<8x1xf32>
    %55 = tpu.reciprocal %54 {approx = true} : vector<8x1xf32> -> vector<8x1xf32>
    %56 = vector.broadcast %55 : vector<8x1xf32> to vector<8x16xf32>
    %57 = arith.mulf %52, %56 : vector<8x16xf32>
    %58 = arith.truncf %57 : vector<8x16xf32> to vector<8x16xbf16>
    %c0_27 = arith.constant 0 : index
    %c0_28 = arith.constant 0 : index
    %c0_29 = arith.constant 0 : index
    %59 = vector.load %arg24[%c0_27, %c0_28, %c0_29] : memref<4x16x16xbf16, #tpu.memory_space<vmem>>, vector<1x16x16xbf16>
    %60 = vector.shape_cast %59 : vector<1x16x16xbf16> to vector<16x16xbf16>
    %cst_30 = arith.constant dense<0.000000e+00> : vector<8x16xf32>
    %61 = tpu.matmul %58, %60, %cst_30 {dimension_numbers = #tpu.dot_dimension_numbers<[1], [0], [0], [1], [0, 0, 1, 1], [], []>} : vector<8x16xbf16>, vector<16x16xbf16>, vector<8x16xf32> -> vector<8x16xf32>
    %62 = arith.truncf %61 : vector<8x16xf32> to vector<8x16xbf16>
    %c0_31 = arith.constant 0 : index
    %c0_32 = arith.constant 0 : index
    %c0_33 = arith.constant 0 : index
    %63 = vector.load %arg7[%c0_31, %c0_32, %c0_33] : memref<4x16x64xbf16, #tpu.memory_space<vmem>>, vector<1x16x64xbf16>
    %64 = vector.shape_cast %63 : vector<1x16x64xbf16> to vector<16x64xbf16>
    %cst_34 = arith.constant dense<0.000000e+00> : vector<8x64xf32>
    %65 = tpu.matmul %62, %64, %cst_34 {dimension_numbers = #tpu.dot_dimension_numbers<[1], [0], [0], [1], [0, 0, 1, 1], [], []>} : vector<8x16xbf16>, vector<16x64xbf16>, vector<8x64xf32> -> vector<8x64xf32>
    %66 = arith.addf %33, %65 : vector<8x64xf32>
    %c1 = arith.constant 1 : index
    %c0_35 = arith.constant 0 : index
    %c0_36 = arith.constant 0 : index
    %67 = vector.load %arg4[%c1, %c0_35, %c0_36] : memref<4x64x16xbf16, #tpu.memory_space<vmem>>, vector<1x64x16xbf16>
    %68 = vector.shape_cast %67 : vector<1x64x16xbf16> to vector<64x16xbf16>
    %cst_37 = arith.constant dense<0.000000e+00> : vector<8x16xf32>
    %69 = tpu.matmul %32, %68, %cst_37 {dimension_numbers = #tpu.dot_dimension_numbers<[1], [0], [0], [1], [0, 0, 1, 1], [], []>} : vector<8x64xbf16>, vector<64x16xbf16>, vector<8x16xf32> -> vector<8x16xf32>
    %c1_38 = arith.constant 1 : index
    %c0_39 = arith.constant 0 : index
    %c0_40 = arith.constant 0 : index
    %70 = vector.load %arg12[%c1_38, %c0_39, %c0_40] : memref<4x1x16xf32, #tpu.memory_space<vmem>>, vector<1x1x16xf32>
    %71 = vector.shape_cast %70 : vector<1x1x16xf32> to vector<1x16xf32>
    %72 = vector.broadcast %71 : vector<1x16xf32> to vector<8x16xf32>
    %73 = arith.addf %69, %72 : vector<8x16xf32>
    %74 = arith.truncf %73 : vector<8x16xf32> to vector<8x16xbf16>
    %c1_41 = arith.constant 1 : index
    %c0_42 = arith.constant 0 : index
    %c0_43 = arith.constant 0 : index
    %75 = vector.load %arg23[%c1_41, %c0_42, %c0_43] : memref<4x16x16xbf16, #tpu.memory_space<vmem>>, vector<1x16x16xbf16>
    %76 = vector.shape_cast %75 : vector<1x16x16xbf16> to vector<16x16xbf16>
    %cst_44 = arith.constant dense<0.000000e+00> : vector<8x16xf32>
    %77 = tpu.matmul %74, %76, %cst_44 {dimension_numbers = #tpu.dot_dimension_numbers<[1], [1], [0], [0], [0, 0, 1, 0], [], []>} : vector<8x16xbf16>, vector<16x16xbf16>, vector<8x16xf32> -> vector<8x16xf32>
    %c1_45 = arith.constant 1 : index
    %c0_46 = arith.constant 0 : index
    %c0_47 = arith.constant 0 : index
    %78 = vector.load %arg3[%c1_45, %c0_46, %c0_47] : memref<4x8x16xf32, #tpu.memory_space<vmem>>, vector<1x8x16xf32>
    %79 = vector.shape_cast %78 : vector<1x8x16xf32> to vector<8x16xf32>
    %80 = arith.addf %77, %79 : vector<8x16xf32>
    %cst_48 = arith.constant dense<0xFF800000> : vector<8xf32>
    %81 = vector.multi_reduction <maximumf>, %80, %cst_48 [1] : vector<8x16xf32> to vector<8xf32>
    %82 = vector.shape_cast %81 : vector<8xf32> to vector<8x1xf32>
    %83 = vector.broadcast %82 : vector<8x1xf32> to vector<8x16xf32>
    %84 = arith.subf %80, %83 : vector<8x16xf32>
    %85 = math.exp %84 : vector<8x16xf32>
    %cst_49 = arith.constant dense<0.000000e+00> : vector<8xf32>
    %86 = vector.multi_reduction <add>, %85, %cst_49 [1] : vector<8x16xf32> to vector<8xf32>
    %87 = vector.shape_cast %86 : vector<8xf32> to vector<8x1xf32>
    %88 = tpu.reciprocal %87 {approx = true} : vector<8x1xf32> -> vector<8x1xf32>
    %89 = vector.broadcast %88 : vector<8x1xf32> to vector<8x16xf32>
    %90 = arith.mulf %85, %89 : vector<8x16xf32>
    %91 = arith.truncf %90 : vector<8x16xf32> to vector<8x16xbf16>
    %c1_50 = arith.constant 1 : index
    %c0_51 = arith.constant 0 : index
    %c0_52 = arith.constant 0 : index
    %92 = vector.load %arg24[%c1_50, %c0_51, %c0_52] : memref<4x16x16xbf16, #tpu.memory_space<vmem>>, vector<1x16x16xbf16>
    %93 = vector.shape_cast %92 : vector<1x16x16xbf16> to vector<16x16xbf16>
    %cst_53 = arith.constant dense<0.000000e+00> : vector<8x16xf32>
    %94 = tpu.matmul %91, %93, %cst_53 {dimension_numbers = #tpu.dot_dimension_numbers<[1], [0], [0], [1], [0, 0, 1, 1], [], []>} : vector<8x16xbf16>, vector<16x16xbf16>, vector<8x16xf32> -> vector<8x16xf32>
    %95 = arith.truncf %94 : vector<8x16xf32> to vector<8x16xbf16>
    %c1_54 = arith.constant 1 : index
    %c0_55 = arith.constant 0 : index
    %c0_56 = arith.constant 0 : index
    %96 = vector.load %arg7[%c1_54, %c0_55, %c0_56] : memref<4x16x64xbf16, #tpu.memory_space<vmem>>, vector<1x16x64xbf16>
    %97 = vector.shape_cast %96 : vector<1x16x64xbf16> to vector<16x64xbf16>
    %cst_57 = arith.constant dense<0.000000e+00> : vector<8x64xf32>
    %98 = tpu.matmul %95, %97, %cst_57 {dimension_numbers = #tpu.dot_dimension_numbers<[1], [0], [0], [1], [0, 0, 1, 1], [], []>} : vector<8x16xbf16>, vector<16x64xbf16>, vector<8x64xf32> -> vector<8x64xf32>
    %99 = arith.addf %66, %98 : vector<8x64xf32>
    %c2 = arith.constant 2 : index
    %c0_58 = arith.constant 0 : index
    %c0_59 = arith.constant 0 : index
    %100 = vector.load %arg4[%c2, %c0_58, %c0_59] : memref<4x64x16xbf16, #tpu.memory_space<vmem>>, vector<1x64x16xbf16>
    %101 = vector.shape_cast %100 : vector<1x64x16xbf16> to vector<64x16xbf16>
    %cst_60 = arith.constant dense<0.000000e+00> : vector<8x16xf32>
    %102 = tpu.matmul %32, %101, %cst_60 {dimension_numbers = #tpu.dot_dimension_numbers<[1], [0], [0], [1], [0, 0, 1, 1], [], []>} : vector<8x64xbf16>, vector<64x16xbf16>, vector<8x16xf32> -> vector<8x16xf32>
    %c2_61 = arith.constant 2 : index
    %c0_62 = arith.constant 0 : index
    %c0_63 = arith.constant 0 : index
    %103 = vector.load %arg12[%c2_61, %c0_62, %c0_63] : memref<4x1x16xf32, #tpu.memory_space<vmem>>, vector<1x1x16xf32>
    %104 = vector.shape_cast %103 : vector<1x1x16xf32> to vector<1x16xf32>
    %105 = vector.broadcast %104 : vector<1x16xf32> to vector<8x16xf32>
    %106 = arith.addf %102, %105 : vector<8x16xf32>
    %107 = arith.truncf %106 : vector<8x16xf32> to vector<8x16xbf16>
    %c2_64 = arith.constant 2 : index
    %c0_65 = arith.constant 0 : index
    %c0_66 = arith.constant 0 : index
    %108 = vector.load %arg23[%c2_64, %c0_65, %c0_66] : memref<4x16x16xbf16, #tpu.memory_space<vmem>>, vector<1x16x16xbf16>
    %109 = vector.shape_cast %108 : vector<1x16x16xbf16> to vector<16x16xbf16>
    %cst_67 = arith.constant dense<0.000000e+00> : vector<8x16xf32>
    %110 = tpu.matmul %107, %109, %cst_67 {dimension_numbers = #tpu.dot_dimension_numbers<[1], [1], [0], [0], [0, 0, 1, 0], [], []>} : vector<8x16xbf16>, vector<16x16xbf16>, vector<8x16xf32> -> vector<8x16xf32>
    %c2_68 = arith.constant 2 : index
    %c0_69 = arith.constant 0 : index
    %c0_70 = arith.constant 0 : index
    %111 = vector.load %arg3[%c2_68, %c0_69, %c0_70] : memref<4x8x16xf32, #tpu.memory_space<vmem>>, vector<1x8x16xf32>
    %112 = vector.shape_cast %111 : vector<1x8x16xf32> to vector<8x16xf32>
    %113 = arith.addf %110, %112 : vector<8x16xf32>
    %cst_71 = arith.constant dense<0xFF800000> : vector<8xf32>
    %114 = vector.multi_reduction <maximumf>, %113, %cst_71 [1] : vector<8x16xf32> to vector<8xf32>
    %115 = vector.shape_cast %114 : vector<8xf32> to vector<8x1xf32>
    %116 = vector.broadcast %115 : vector<8x1xf32> to vector<8x16xf32>
    %117 = arith.subf %113, %116 : vector<8x16xf32>
    %118 = math.exp %117 : vector<8x16xf32>
    %cst_72 = arith.constant dense<0.000000e+00> : vector<8xf32>
    %119 = vector.multi_reduction <add>, %118, %cst_72 [1] : vector<8x16xf32> to vector<8xf32>
    %120 = vector.shape_cast %119 : vector<8xf32> to vector<8x1xf32>
    %121 = tpu.reciprocal %120 {approx = true} : vector<8x1xf32> -> vector<8x1xf32>
    %122 = vector.broadcast %121 : vector<8x1xf32> to vector<8x16xf32>
    %123 = arith.mulf %118, %122 : vector<8x16xf32>
    %124 = arith.truncf %123 : vector<8x16xf32> to vector<8x16xbf16>
    %c2_73 = arith.constant 2 : index
    %c0_74 = arith.constant 0 : index
    %c0_75 = arith.constant 0 : index
    %125 = vector.load %arg24[%c2_73, %c0_74, %c0_75] : memref<4x16x16xbf16, #tpu.memory_space<vmem>>, vector<1x16x16xbf16>
    %126 = vector.shape_cast %125 : vector<1x16x16xbf16> to vector<16x16xbf16>
    %cst_76 = arith.constant dense<0.000000e+00> : vector<8x16xf32>
    %127 = tpu.matmul %124, %126, %cst_76 {dimension_numbers = #tpu.dot_dimension_numbers<[1], [0], [0], [1], [0, 0, 1, 1], [], []>} : vector<8x16xbf16>, vector<16x16xbf16>, vector<8x16xf32> -> vector<8x16xf32>
    %128 = arith.truncf %127 : vector<8x16xf32> to vector<8x16xbf16>
    %c2_77 = arith.constant 2 : index
    %c0_78 = arith.constant 0 : index
    %c0_79 = arith.constant 0 : index
    %129 = vector.load %arg7[%c2_77, %c0_78, %c0_79] : memref<4x16x64xbf16, #tpu.memory_space<vmem>>, vector<1x16x64xbf16>
    %130 = vector.shape_cast %129 : vector<1x16x64xbf16> to vector<16x64xbf16>
    %cst_80 = arith.constant dense<0.000000e+00> : vector<8x64xf32>
    %131 = tpu.matmul %128, %130, %cst_80 {dimension_numbers = #tpu.dot_dimension_numbers<[1], [0], [0], [1], [0, 0, 1, 1], [], []>} : vector<8x16xbf16>, vector<16x64xbf16>, vector<8x64xf32> -> vector<8x64xf32>
    %132 = arith.addf %99, %131 : vector<8x64xf32>
    %c3 = arith.constant 3 : index
    %c0_81 = arith.constant 0 : index
    %c0_82 = arith.constant 0 : index
    %133 = vector.load %arg4[%c3, %c0_81, %c0_82] : memref<4x64x16xbf16, #tpu.memory_space<vmem>>, vector<1x64x16xbf16>
    %134 = vector.shape_cast %133 : vector<1x64x16xbf16> to vector<64x16xbf16>
    %cst_83 = arith.constant dense<0.000000e+00> : vector<8x16xf32>
    %135 = tpu.matmul %32, %134, %cst_83 {dimension_numbers = #tpu.dot_dimension_numbers<[1], [0], [0], [1], [0, 0, 1, 1], [], []>} : vector<8x64xbf16>, vector<64x16xbf16>, vector<8x16xf32> -> vector<8x16xf32>
    %c3_84 = arith.constant 3 : index
    %c0_85 = arith.constant 0 : index
    %c0_86 = arith.constant 0 : index
    %136 = vector.load %arg12[%c3_84, %c0_85, %c0_86] : memref<4x1x16xf32, #tpu.memory_space<vmem>>, vector<1x1x16xf32>
    %137 = vector.shape_cast %136 : vector<1x1x16xf32> to vector<1x16xf32>
    %138 = vector.broadcast %137 : vector<1x16xf32> to vector<8x16xf32>
    %139 = arith.addf %135, %138 : vector<8x16xf32>
    %140 = arith.truncf %139 : vector<8x16xf32> to vector<8x16xbf16>
    %c3_87 = arith.constant 3 : index
    %c0_88 = arith.constant 0 : index
    %c0_89 = arith.constant 0 : index
    %141 = vector.load %arg23[%c3_87, %c0_88, %c0_89] : memref<4x16x16xbf16, #tpu.memory_space<vmem>>, vector<1x16x16xbf16>
    %142 = vector.shape_cast %141 : vector<1x16x16xbf16> to vector<16x16xbf16>
    %cst_90 = arith.constant dense<0.000000e+00> : vector<8x16xf32>
    %143 = tpu.matmul %140, %142, %cst_90 {dimension_numbers = #tpu.dot_dimension_numbers<[1], [1], [0], [0], [0, 0, 1, 0], [], []>} : vector<8x16xbf16>, vector<16x16xbf16>, vector<8x16xf32> -> vector<8x16xf32>
    %c3_91 = arith.constant 3 : index
    %c0_92 = arith.constant 0 : index
    %c0_93 = arith.constant 0 : index
    %144 = vector.load %arg3[%c3_91, %c0_92, %c0_93] : memref<4x8x16xf32, #tpu.memory_space<vmem>>, vector<1x8x16xf32>
    %145 = vector.shape_cast %144 : vector<1x8x16xf32> to vector<8x16xf32>
    %146 = arith.addf %143, %145 : vector<8x16xf32>
    %cst_94 = arith.constant dense<0xFF800000> : vector<8xf32>
    %147 = vector.multi_reduction <maximumf>, %146, %cst_94 [1] : vector<8x16xf32> to vector<8xf32>
    %148 = vector.shape_cast %147 : vector<8xf32> to vector<8x1xf32>
    %149 = vector.broadcast %148 : vector<8x1xf32> to vector<8x16xf32>
    %150 = arith.subf %146, %149 : vector<8x16xf32>
    %151 = math.exp %150 : vector<8x16xf32>
    %cst_95 = arith.constant dense<0.000000e+00> : vector<8xf32>
    %152 = vector.multi_reduction <add>, %151, %cst_95 [1] : vector<8x16xf32> to vector<8xf32>
    %153 = vector.shape_cast %152 : vector<8xf32> to vector<8x1xf32>
    %154 = tpu.reciprocal %153 {approx = true} : vector<8x1xf32> -> vector<8x1xf32>
    %155 = vector.broadcast %154 : vector<8x1xf32> to vector<8x16xf32>
    %156 = arith.mulf %151, %155 : vector<8x16xf32>
    %157 = arith.truncf %156 : vector<8x16xf32> to vector<8x16xbf16>
    %c3_96 = arith.constant 3 : index
    %c0_97 = arith.constant 0 : index
    %c0_98 = arith.constant 0 : index
    %158 = vector.load %arg24[%c3_96, %c0_97, %c0_98] : memref<4x16x16xbf16, #tpu.memory_space<vmem>>, vector<1x16x16xbf16>
    %159 = vector.shape_cast %158 : vector<1x16x16xbf16> to vector<16x16xbf16>
    %cst_99 = arith.constant dense<0.000000e+00> : vector<8x16xf32>
    %160 = tpu.matmul %157, %159, %cst_99 {dimension_numbers = #tpu.dot_dimension_numbers<[1], [0], [0], [1], [0, 0, 1, 1], [], []>} : vector<8x16xbf16>, vector<16x16xbf16>, vector<8x16xf32> -> vector<8x16xf32>
    %161 = arith.truncf %160 : vector<8x16xf32> to vector<8x16xbf16>
    %c3_100 = arith.constant 3 : index
    %c0_101 = arith.constant 0 : index
    %c0_102 = arith.constant 0 : index
    %162 = vector.load %arg7[%c3_100, %c0_101, %c0_102] : memref<4x16x64xbf16, #tpu.memory_space<vmem>>, vector<1x16x64xbf16>
    %163 = vector.shape_cast %162 : vector<1x16x64xbf16> to vector<16x64xbf16>
    %cst_103 = arith.constant dense<0.000000e+00> : vector<8x64xf32>
    %164 = tpu.matmul %161, %163, %cst_103 {dimension_numbers = #tpu.dot_dimension_numbers<[1], [0], [0], [1], [0, 0, 1, 1], [], []>} : vector<8x16xbf16>, vector<16x64xbf16>, vector<8x64xf32> -> vector<8x64xf32>
    %165 = arith.addf %132, %164 : vector<8x64xf32>
    %c0_104 = arith.constant 0 : index
    %c0_105 = arith.constant 0 : index
    %166 = vector.load %arg14[%c0_104, %c0_105] : memref<1x64xf32, #tpu.memory_space<vmem>>, vector<1x64xf32>
    %167 = vector.broadcast %166 : vector<1x64xf32> to vector<8x64xf32>
    %168 = arith.addf %165, %167 : vector<8x64xf32>
    %c0_106 = arith.constant 0 : index
    %c0_107 = arith.constant 0 : index
    %169 = vector.load %arg19[%c0_106, %c0_107] : memref<1x64xf32, #tpu.memory_space<vmem>>, vector<1x64xf32>
    %170 = vector.broadcast %169 : vector<1x64xf32> to vector<8x64xf32>
    %171 = arith.mulf %170, %168 : vector<8x64xf32>
    %172 = arith.addf %7, %171 : vector<8x64xf32>
    %c0_108 = arith.constant 0 : index
    %c0_109 = arith.constant 0 : index
    %173 = vector.load %arg15[%c0_108, %c0_109] : memref<1x64xf32, #tpu.memory_space<vmem>>, vector<1x64xf32>
    %c0_110 = arith.constant 0 : index
    %c0_111 = arith.constant 0 : index
    %174 = vector.load %arg16[%c0_110, %c0_111] : memref<1x64xf32, #tpu.memory_space<vmem>>, vector<1x64xf32>
    %cst_112 = arith.constant dense<0.000000e+00> : vector<8xf32>
    %175 = vector.multi_reduction <add>, %172, %cst_112 [1] : vector<8x64xf32> to vector<8xf32>
    %176 = vector.shape_cast %175 : vector<8xf32> to vector<8x1xf32>
    %cst_113 = arith.constant 6.400000e+01 : f32
    %177 = vector.broadcast %cst_113 : f32 to vector<8x1xf32>
    %178 = arith.divf %176, %177 : vector<8x1xf32>
    %179 = vector.broadcast %178 : vector<8x1xf32> to vector<8x64xf32>
    %180 = arith.subf %172, %179 : vector<8x64xf32>
    %181 = arith.mulf %180, %180 : vector<8x64xf32>
    %cst_114 = arith.constant dense<0.000000e+00> : vector<8xf32>
    %182 = vector.multi_reduction <add>, %181, %cst_114 [1] : vector<8x64xf32> to vector<8xf32>
    %183 = vector.shape_cast %182 : vector<8xf32> to vector<8x1xf32>
    %cst_115 = arith.constant 6.400000e+01 : f32
    %184 = vector.broadcast %cst_115 : f32 to vector<8x1xf32>
    %185 = arith.divf %183, %184 : vector<8x1xf32>
    %186 = vector.broadcast %178 : vector<8x1xf32> to vector<8x64xf32>
    %187 = arith.subf %172, %186 : vector<8x64xf32>
    %cst_116 = arith.constant 9.99999974E-6 : f32
    %188 = vector.broadcast %cst_116 : f32 to vector<8x1xf32>
    %189 = arith.addf %185, %188 : vector<8x1xf32>
    %190 = math.rsqrt %189 : vector<8x1xf32>
    %191 = vector.broadcast %190 : vector<8x1xf32> to vector<8x64xf32>
    %192 = arith.mulf %187, %191 : vector<8x64xf32>
    %193 = vector.broadcast %173 : vector<1x64xf32> to vector<8x64xf32>
    %194 = arith.mulf %192, %193 : vector<8x64xf32>
    %195 = vector.broadcast %174 : vector<1x64xf32> to vector<8x64xf32>
    %196 = arith.addf %194, %195 : vector<8x64xf32>
    %197 = arith.truncf %196 : vector<8x64xf32> to vector<8x64xbf16>
    %c0_117 = arith.constant 0 : index
    %c0_118 = arith.constant 0 : index
    %198 = vector.load %arg8[%c0_117, %c0_118] : memref<64x256xbf16, #tpu.memory_space<vmem>>, vector<64x256xbf16>
    %cst_119 = arith.constant dense<0.000000e+00> : vector<8x256xf32>
    %199 = tpu.matmul %197, %198, %cst_119 {dimension_numbers = #tpu.dot_dimension_numbers<[1], [0], [0], [1], [0, 0, 1, 1], [], []>} : vector<8x64xbf16>, vector<64x256xbf16>, vector<8x256xf32> -> vector<8x256xf32>
    %c0_120 = arith.constant 0 : index
    %c0_121 = arith.constant 0 : index
    %200 = vector.load %arg17[%c0_120, %c0_121] : memref<1x256xf32, #tpu.memory_space<vmem>>, vector<1x256xf32>
    %201 = vector.broadcast %200 : vector<1x256xf32> to vector<8x256xf32>
    %202 = arith.addf %199, %201 : vector<8x256xf32>
    %cst_122 = arith.constant 5.000000e-01 : f32
    %203 = vector.broadcast %cst_122 : f32 to vector<8x256xf32>
    %204 = arith.mulf %203, %202 : vector<8x256xf32>
    %cst_123 = arith.constant 0.707106769 : f32
    %205 = vector.broadcast %cst_123 : f32 to vector<8x256xf32>
    %206 = arith.mulf %202, %205 : vector<8x256xf32>
    %207 = math.erf %206 : vector<8x256xf32>
    %cst_124 = arith.constant 1.000000e+00 : f32
    %208 = vector.broadcast %cst_124 : f32 to vector<8x256xf32>
    %209 = arith.addf %208, %207 : vector<8x256xf32>
    %210 = arith.mulf %204, %209 : vector<8x256xf32>
    %211 = arith.truncf %210 : vector<8x256xf32> to vector<8x256xbf16>
    %c0_125 = arith.constant 0 : index
    %c0_126 = arith.constant 0 : index
    %212 = vector.load %arg9[%c0_125, %c0_126] : memref<256x64xbf16, #tpu.memory_space<vmem>>, vector<256x64xbf16>
    %cst_127 = arith.constant dense<0.000000e+00> : vector<8x64xf32>
    %213 = tpu.matmul %211, %212, %cst_127 {dimension_numbers = #tpu.dot_dimension_numbers<[1], [0], [0], [1], [0, 0, 1, 1], [], []>} : vector<8x256xbf16>, vector<256x64xbf16>, vector<8x64xf32> -> vector<8x64xf32>
    %c0_128 = arith.constant 0 : index
    %c0_129 = arith.constant 0 : index
    %214 = vector.load %arg18[%c0_128, %c0_129] : memref<1x64xf32, #tpu.memory_space<vmem>>, vector<1x64xf32>
    %215 = vector.broadcast %214 : vector<1x64xf32> to vector<8x64xf32>
    %216 = arith.addf %213, %215 : vector<8x64xf32>
    %c0_130 = arith.constant 0 : index
    %c0_131 = arith.constant 0 : index
    %217 = vector.load %arg20[%c0_130, %c0_131] : memref<1x64xf32, #tpu.memory_space<vmem>>, vector<1x64xf32>
    %218 = vector.broadcast %217 : vector<1x64xf32> to vector<8x64xf32>
    %219 = arith.mulf %218, %216 : vector<8x64xf32>
    %220 = arith.addf %172, %219 : vector<8x64xf32>
    %c0_132 = arith.constant 0 : index
    %c0_133 = arith.constant 0 : index
    %c0_134 = arith.constant 0 : index
    %221 = vector.load %arg21[%c0_132, %c0_133, %c0_134] : memref<1x8x64xf32, #tpu.memory_space<vmem>>, vector<1x8x64xf32>
    %222 = vector.shape_cast %221 : vector<1x8x64xf32> to vector<8x64xf32>
    %223 = vector.shape_cast %220 : vector<8x64xf32> to vector<1x8x64xf32>
    tpu.vector_store %arg21[%c0_132, %c0_133, %c0_134], %223 {strides = array<i32>} : memref<1x8x64xf32, #tpu.memory_space<vmem>>, vector<1x8x64xf32>,
    %c0_135 = arith.constant 0 : index
    %c0_136 = arith.constant 0 : index
    %c0_137 = arith.constant 0 : index
    %224 = vector.load %arg22[%c0_135, %c0_136, %c0_137] : memref<1x8x64xf32, #tpu.memory_space<vmem>>, vector<1x8x64xf32>
    %225 = vector.shape_cast %224 : vector<1x8x64xf32> to vector<8x64xf32>
    %226 = vector.shape_cast %219 : vector<8x64xf32> to vector<1x8x64xf32>
    tpu.vector_store %arg22[%c0_135, %c0_136, %c0_137], %226 {strides = array<i32>} : memref<1x8x64xf32, #tpu.memory_space<vmem>>, vector<1x8x64xf32>,
    return
  }
  func.func @transform_0(%arg0: i32, %arg1: i32) -> (i32, i32, i32) {
    %c0_i32 = arith.constant 0 : i32
    %c0_i32_0 = arith.constant 0 : i32
    %c0_i32_1 = arith.constant 0 : i32
    return %arg0, %c0_i32, %c0_i32_0 : i32, i32, i32
  }
  func.func @transform_1(%arg0: i32, %arg1: i32) -> (i32, i32, i32) {
    %c0_i32 = arith.constant 0 : i32
    %c0_i32_0 = arith.constant 0 : i32
    %c0_i32_1 = arith.constant 0 : i32
    return %c0_i32, %arg1, %c0_i32_0 : i32, i32, i32
  }
  func.func @transform_2(%arg0: i32, %arg1: i32) -> (i32, i32, i32) {
    %c0_i32 = arith.constant 0 : i32
    %c0_i32_0 = arith.constant 0 : i32
    %c0_i32_1 = arith.constant 0 : i32
    %c0_i32_2 = arith.constant 0 : i32
    return %c0_i32, %c0_i32_0, %c0_i32_1 : i32, i32, i32
  }
  func.func @transform_3(%arg0: i32, %arg1: i32) -> (i32, i32, i32) {
    %c0_i32 = arith.constant 0 : i32
    %c0_i32_0 = arith.constant 0 : i32
    %c0_i32_1 = arith.constant 0 : i32
    %c0_i32_2 = arith.constant 0 : i32
    return %c0_i32, %c0_i32_0, %c0_i32_1 : i32, i32, i32
  }
  func.func @transform_4(%arg0: i32, %arg1: i32) -> (i32, i32, i32) {
    %c0_i32 = arith.constant 0 : i32
    %c0_i32_0 = arith.constant 0 : i32
    %c0_i32_1 = arith.constant 0 : i32
    %c0_i32_2 = arith.constant 0 : i32
    return %c0_i32, %c0_i32_0, %c0_i32_1 : i32, i32, i32
  }
  func.func @transform_5(%arg0: i32, %arg1: i32) -> (i32, i32, i32) {
    %c0_i32 = arith.constant 0 : i32
    %c0_i32_0 = arith.constant 0 : i32
    %c0_i32_1 = arith.constant 0 : i32
    %c0_i32_2 = arith.constant 0 : i32
    return %c0_i32, %c0_i32_0, %c0_i32_1 : i32, i32, i32
  }
  func.func @transform_6(%arg0: i32, %arg1: i32) -> (i32, i32) {
    %c0_i32 = arith.constant 0 : i32
    %c0_i32_0 = arith.constant 0 : i32
    %c0_i32_1 = arith.constant 0 : i32
    return %c0_i32, %c0_i32_0 : i32, i32
  }
  func.func @transform_7(%arg0: i32, %arg1: i32) -> (i32, i32) {
    %c0_i32 = arith.constant 0 : i32
    %c0_i32_0 = arith.constant 0 : i32
    %c0_i32_1 = arith.constant 0 : i32
    return %c0_i32, %c0_i32_0 : i32, i32
  }
  func.func @transform_8(%arg0: i32, %arg1: i32) -> (i32, i32) {
    %c0_i32 = arith.constant 0 : i32
    %c0_i32_0 = arith.constant 0 : i32
    %c0_i32_1 = arith.constant 0 : i32
    return %c0_i32, %c0_i32_0 : i32, i32
  }
  func.func @transform_9(%arg0: i32, %arg1: i32) -> (i32, i32) {
    %c0_i32 = arith.constant 0 : i32
    %c0_i32_0 = arith.constant 0 : i32
    %c0_i32_1 = arith.constant 0 : i32
    return %c0_i32, %c0_i32_0 : i32, i32
  }
  func.func @transform_10(%arg0: i32, %arg1: i32) -> (i32, i32, i32) {
    %c0_i32 = arith.constant 0 : i32
    %c0_i32_0 = arith.constant 0 : i32
    %c0_i32_1 = arith.constant 0 : i32
    %c0_i32_2 = arith.constant 0 : i32
    return %c0_i32, %c0_i32_0, %c0_i32_1 : i32, i32, i32
  }
  func.func @transform_11(%arg0: i32, %arg1: i32) -> (i32, i32, i32) {
    %c0_i32 = arith.constant 0 : i32
    %c0_i32_0 = arith.constant 0 : i32
    %c0_i32_1 = arith.constant 0 : i32
    %c0_i32_2 = arith.constant 0 : i32
    return %c0_i32, %c0_i32_0, %c0_i32_1 : i32, i32, i32
  }
  func.func @transform_12(%arg0: i32, %arg1: i32) -> (i32, i32) {
    %c0_i32 = arith.constant 0 : i32
    %c0_i32_0 = arith.constant 0 : i32
    %c0_i32_1 = arith.constant 0 : i32
    return %c0_i32, %c0_i32_0 : i32, i32
  }
  func.func @transform_13(%arg0: i32, %arg1: i32) -> (i32, i32) {
    %c0_i32 = arith.constant 0 : i32
    %c0_i32_0 = arith.constant 0 : i32
    %c0_i32_1 = arith.constant 0 : i32
    return %c0_i32, %c0_i32_0 : i32, i32
  }
  func.func @transform_14(%arg0: i32, %arg1: i32) -> (i32, i32) {
    %c0_i32 = arith.constant 0 : i32
    %c0_i32_0 = arith.constant 0 : i32
    %c0_i32_1 = arith.constant 0 : i32
    return %c0_i32, %c0_i32_0 : i32, i32
  }
  func.func @transform_15(%arg0: i32, %arg1: i32) -> (i32, i32) {
    %c0_i32 = arith.constant 0 : i32
    %c0_i32_0 = arith.constant 0 : i32
    %c0_i32_1 = arith.constant 0 : i32
    return %c0_i32, %c0_i32_0 : i32, i32
  }
  func.func @transform_16(%arg0: i32, %arg1: i32) -> (i32, i32) {
    %c0_i32 = arith.constant 0 : i32
    %c0_i32_0 = arith.constant 0 : i32
    %c0_i32_1 = arith.constant 0 : i32
    return %c0_i32, %c0_i32_0 : i32, i32
  }
  func.func @transform_17(%arg0: i32, %arg1: i32) -> (i32, i32) {
    %c0_i32 = arith.constant 0 : i32
    %c0_i32_0 = arith.constant 0 : i32
    %c0_i32_1 = arith.constant 0 : i32
    return %c0_i32, %c0_i32_0 : i32, i32
  }
  func.func @transform_18(%arg0: i32, %arg1: i32) -> (i32, i32) {
    %c0_i32 = arith.constant 0 : i32
    %c0_i32_0 = arith.constant 0 : i32
    %c0_i32_1 = arith.constant 0 : i32
    return %c0_i32, %c0_i32_0 : i32, i32
  }
  func.func @transform_19(%arg0: i32, %arg1: i32) -> (i32, i32, i32) {
    %c0_i32 = arith.constant 0 : i32
    %c0_i32_0 = arith.constant 0 : i32
    return %arg0, %arg1, %c0_i32 : i32, i32, i32
  }
  func.func @transform_20(%arg0: i32, %arg1: i32) -> (i32, i32, i32) {
    %c0_i32 = arith.constant 0 : i32
    %c0_i32_0 = arith.constant 0 : i32
    return %arg0, %arg1, %c0_i32 : i32, i32, i32
  }
}

</mosaic_0001>

<bundles_post_ra>
// kernel: tpu_custom_call.1
= control target key start
LH: loop header
LB: loop body
LE: loop exit
PB: predicated region body
PF: predicated region fallthrough
CT: control target
= control target key end

     0   :  { %s3994_s0 = inlined_call_operand.vmem [shape: f32[2,16,64], index: 0, kind: input, shape index: {}]   ;;  %s3995_s1 = inlined_call_operand.vmem [shape: f32[4,16,16], index: 1, kind: input, shape index: {}]   ;;  %s3996_s2 = inlined_call_operand.vmem [shape: bf16[4,64,16], index: 2, kind: input, shape index: {}]   ;;  %s3997_s3 = inlined_call_operand.vmem [shape: bf16[4,64,16], index: 3, kind: input, shape index: {}]   ;;  %s3998_s4 = inlined_call_operand.vmem [shape: bf16[4,64,16], index: 4, kind: input, shape index: {}]   ;;  %s3999_s5 = inlined_call_operand.vmem [shape: bf16[4,16,64], index: 5, kind: input, shape index: {}]   ;;  %s4000_s6 = inlined_call_operand.vmem [shape: bf16[64,256], index: 6, kind: input, shape index: {}]   ;;  %s4001_s7 = inlined_call_operand.vmem [shape: bf16[256,64], index: 7, kind: input, shape index: {}]   ;;  %s4002_s8 = inlined_call_operand.vmem [shape: f32[1,64], index: 8, kind: input, shape index: {}]   ;;  %s4003_s9 = inlined_call_operand.vmem [shape: f32[1,64], index: 9, kind: input, shape index: {}]   ;;  %s4004_s10 = inlined_call_operand.vmem [shape: f32[4,1,16], index: 10, kind: input, shape index: {}]   ;;  %s4005_s11 = inlined_call_operand.vmem [shape: f32[4,1,16], index: 11, kind: input, shape index: {}]   ;;  %s4006_s12 = inlined_call_operand.vmem [shape: f32[1,64], index: 12, kind: input, shape index: {}]   ;;  %s4007_s13 = inlined_call_operand.vmem [shape: f32[1,64], index: 13, kind: input, shape index: {}]   ;;  %s4008_s14 = inlined_call_operand.vmem [shape: f32[1,64], index: 14, kind: input, shape index: {}]   ;;  %s4009_s15 = inlined_call_operand.vmem [shape: f32[1,256], index: 15, kind: input, shape index: {}]   ;;  %s4010_s16 = inlined_call_operand.vmem [shape: f32[1,64], index: 16, kind: input, shape index: {}]   ;;  %s4011_s17 = inlined_call_operand.vmem [shape: f32[1,64], index: 17, kind: input, shape index: {}]   ;;  %s4012_s18 = inlined_call_operand.vmem [shape: f32[1,64], index: 18, kind: input, shape index: {}]   ;;  %s4013_s19 = inlined_call_operand.hbm [shape: f32[2,16,64], index: 19, kind: output, shape index: {0}]   ;;  %s4014_s20 = inlined_call_operand.hbm [shape: f32[2,16,64], index: 20, kind: output, shape index: {1}]  }
   0x1   :  { %4029 = sst [smem:[#allocation20_spill]] %s3994_s0 }
   0x2   :  { %4030 = sst [smem:[#allocation21_spill]] %s3995_s1 }
   0x3   :  { %4031 = sst [smem:[#allocation22_spill]] %s3996_s2 }
   0x4   :  { %4032 = sst [smem:[#allocation23_spill]] %s3997_s3 }
   0x5   :  { %4033 = sst [smem:[#allocation24_spill]] %s3998_s4 }
   0x6   :  { %4034 = sst [smem:[#allocation25_spill]] %s3999_s5 }
   0x7   :  { %4035 = sst [smem:[#allocation26_spill]] %s4000_s6 }
   0x8   :  { %4036 = sst [smem:[#allocation27_spill]] %s4001_s7 }
   0x9   :  { %4037 = sst [smem:[#allocation28_spill]] %s4002_s8 }
   0xa   :  { %4038 = sst [smem:[#allocation29_spill]] %s4003_s9 }
   0xb   :  { %4039 = sst [smem:[#allocation30_spill]] %s4007_s13 }
   0xc   :  { %4040 = sst [smem:[#allocation31_spill]] %s4008_s14 }
   0xd   :  { %4041 = sst [smem:[#allocation32_spill]] %s4009_s15 }
   0xe   :  { %4042 = sst [smem:[#allocation33_spill]] %s4010_s16 }
   0xf   :  { %4043 = sst [smem:[#allocation34_spill]] %s4012_s18 }
  0x10   :  { %4044 = sst [smem:[#allocation35_spill]] %s4013_s19 }
  0x11   :  { %4045 = sst [smem:[#allocation36_spill]] %s4014_s20 }
  0x12   :  { %26 = vsyncpa [#allocation6], 0 }
  0x13   :  { %28 = vsyncpa [#allocation6 + $0x1], 0 }
  0x14   :  { %29 = vsyncpa [#allocation8], 0 }
  0x15   :  { %31 = vsyncpa [#allocation8 + $0x1], 0  ;;  %s3351_s1 = smov 0   ;;  %s3353_s22 = smov 0  }
  0x16   :  { %s3355_s23 = smov 0   ;;  %s3357_s24 = smov 0  }
  0x17   :  { %s3359_s2 = smov 0   ;;  %s3361_s25 = smov 0  }
  0x18   :  { %s3363_s3 = smov 0   ;;  %s3365_s26 = smov 0  }
  0x19   :  { %s3367_s27 = smov 0   ;;  %s3369_s28 = smov 0  }
  0x1a LB: > { %4046 = sst [smem:[#allocation11_spill]] %s3210_s22  ;;  %s2398_s4 = sadd.s32 4294967295, %s3242_s28   ;;  %s3242_s28 = sphi %s3369_s28, %s37_s28   ;;  %s3238_s27 = sphi %s3367_s27, %s4088_s27   ;;  %s3234_s26 = sphi %s3365_s26, %s4087_s26   ;;  %s3230_s3 = sphi %s3363_s3, %s4086_s3   ;;  %s3226_s25 = sphi %s3361_s25, %s4085_s25   ;;  %s3222_s2 = sphi %s3359_s2, %s4084_s2   ;;  %s3218_s24 = sphi %s3357_s24, %s4083_s24   ;;  %s3214_s23 = sphi %s3355_s23, %s4082_s23   ;;  %s3210_s22 = sphi %s3353_s22, %s4081_s22   ;;  %s3206_s1 = sphi %s3351_s1, %s4080_s1  }
  0x1b   : > { %4047 = sst [smem:[#allocation12_spill]] %s3214_s23  ;;  %s2399_s29 = sadd.s32 4294967294, %s3242_s28  }
  0x1c   : > { %4048 = sst [smem:[#allocation13_spill]] %s3222_s2  ;;  %s46_s30 = sadd.s32 1, %s3234_s26 }
  0x1d   : > { %4049 = sst [smem:[#allocation14_spill]] %s3234_s26  ;;  %s49_s0 = sadd.s32 1, %s3238_s27 }
  0x1e   : > { %4050 = sst [smem:[#allocation15_spill]] %s3238_s27  ;;  %p47_p0 = scmp.ge.s32.totalorder %s46_s30, 2 }
  0x1f   : > { %s82_s21 = sadd.s32 1, %s3222_s2  ;;  %p89_p1 = scmp.ne.s32.totalorder %s3222_s2, %s3218_s24 }
  0x20   : > { %p90_p2 = scmp.eq.s32.totalorder %s3242_s28, 0  ;;  %s4090_s30 = smov (%p47_p0, %s46_s30), 0 }
  0x21   : > { %4051 = sst [smem:[#allocation16_spill]] %s4090_s30  ;;  %s4092_s0 = smov (!%p47_p0, %s49_s0), %s3238_s27 }
  0x22   : > { %s79_s19 = ssub.s32 %s3234_s26, %s4090_s30  ;;  %p3414_p3 = por %p90_p2, %p89_p1 }
  0x23   : > { %p51_p4 = scmp.ge.s32.totalorder %s4092_s0, 2  ;;  %p80_p5 = scmp.eq.s32.totalorder %s79_s19, 0 }
  0x24   : > { %s467_s20 = sadd.s32 1, %s3214_s23  ;;  %p477_p6 = scmp.ne.s32.totalorder %s3214_s23, %s3210_s22 }
  0x25   : > { %s4094_s0 = smov (%p51_p4, %s4092_s0), 0  ;;  %p478_p7 = scmp.eq.s32.totalorder %s2398_s4, 3 }
  0x26   : > { %4053 = sst [smem:[#allocation17_spill]] %s4094_s0  ;;  %s462_s15 = ssub.s32 %s3238_s27, %s4094_s0 }
  0x27   : > { %s3424_s16 = scalar_select %p80_p5, %s3222_s2, %s82_s21  }
  0x28   : > { %s464_s7 = sor.u32 %s462_s15, %s79_s19  ;;  %p483_p8 = scmp.ne.s32.totalorder %s3210_s22, %s3206_s1 }
  0x29   : > { %4054 = sst [smem:[#allocation18_spill]] %s3424_s16  ;;  %p465_p9 = scmp.eq.s32.totalorder %s464_s7, 0 }
  0x2a   : > { %p3430_p10 = por %p478_p7, %p477_p6  ;;  %p484_p11 = scmp.eq.s32.totalorder %s2399_s29, 3 }
  0x2b   : > { %s3435_s14 = scalar_select %p465_p9, %s3214_s23, %s467_s20  }
  0x2c   : > { %p3437_p12 = por %p484_p11, %p483_p8  ;;  %p2401_p13 = scmp.ge.s32.totalorder %s3242_s28, 4 }
  0x2d   : > { %4056 = sst [smem:[#allocation19_spill]] %s3435_s14 }
  0x2e   : > { %579 = sbr.rel (%p2401_p13) target bundleno = 65 (0x41), region = 84 }
  0x33   : > { %590 = sbr.rel (!%p3414_p3) target bundleno = 65 (0x41), region = 92  ;;  %s592_s7 = sand.u32 (%p3414_p3), 1, %s3222_s2  }
  0x34   : > { %s2403_s15 = sshll.u32 (%p3414_p3), %s3234_s26, 3  ;;  %s2402_s19 = sshll.u32 (%p3414_p3), %s592_s7, 5 }
  0x35   : > { %s4058_s29 = sld [smem:[#allocation21_spill]] (%p3414_p3)  ;;  %s594_s0 = scalar_lea.vmem (%p3414_p3), [#allocation4], %s2402_s19 }
  0x3b   : > { %s596_s20 = scalar_lea.vmem %s4058_s29, %s2403_s15 }
  0x3c   : > { %v631_v0 = vld [vmem:[%s596_s20] sm:$0xff]  ;;  %v633_v1 = vld [vmem:[%s596_s20 + $0x10] sm:$0xff] }
  0x3d   : > { %v635_v2 = vld [vmem:[%s596_s20 + $0x20] sm:$0xff]  ;;  %632 = vst [vmem:[%s594_s0] sm:$0xff] %v631_v0  ;;  %v637_v3 = vld [vmem:[%s596_s20 + $0x30] sm:$0xff] }
  0x3e   : > { %634 = vst [vmem:[%s594_s0 + $0x8] sm:$0xff] %v633_v1 }
  0x3f   : > { %636 = vst [vmem:[%s594_s0 + $0x10] sm:$0xff] %v635_v2 }
  0x40   : > { %638 = vst [vmem:[%s594_s0 + $0x18] sm:$0xff] %v637_v3 }
  0x41 PF: > { %p2404_p0 = scmp.ge.s32.totalorder %s3242_s28, 1  ;;  %p643_p1 = scmp.lt.s32.totalorder %s3242_s28, 5 }
  0x43   : > { %p644_p2 = pnand %p2404_p0, %p643_p1 }
  0x44   : > { %s650_s18 = sand.u32 (!%p644_p2), 1, %s3218_s24   ;;  %s3453_s7 = sand.u32 (!%p644_p2), 1, %s3210_s22  }
  0x45   : > { %647 = sbr.rel (%p644_p2) target bundleno = 3274 (0xcca), region = 130  ;;  %s2405_s15 = sshll.u32 (!%p644_p2), %s650_s18, 5 }
  0x46   : > { %s2406_s19 = sshll.u32 (!%p644_p2), %s3453_s7, 3  ;;  %p717_p3 = scmp.lt.s32.totalorder (!%p644_p2), %s3230_s3, 1 }
  0x47   : > { %s4059_s20 = sld [smem:[#allocation20_spill]] (!%p644_p2)  ;;  %s3463_s26 = scalar_lea.vmem (!%p644_p2), [#allocation4], %s2405_s15 }
  0x48   : > { %s3465_s16 = scalar_lea.vmem (!%p644_p2), [#allocation5], %s2406_s19  ;;  %s3467_s2 = scalar_lea.vmem (!%p644_p2), [#allocation7], %s2406_s19 }
  0x49   : > { %p2410_p4 = scmp.ne.s32.totalorder (!%p644_p2), %s3226_s25, 0 }
  0x4a   : > { %s718_s0 = scalar_select %p717_p3, %s3230_s3, 1 }
  0x4b   : > { %726 = sbr.rel (%p2410_p4) target bundleno = 521 (0x209), region = 138  ;;  %s4060_s15 = sld [smem:[#allocation23_spill]] (!%p2410_p4) }
  0x4c   : > { %s2871_s4 = sshll.u32 %s718_s0, 4  ;;  %s4062_s8 = sld [smem:[#allocation28_spill]] (!%p2410_p4) }
  0x4d   : > { %s3461_s27 = scalar_lea.vmem %s4059_s20, %s2871_s4  ;;  %s4061_s4 = sld [smem:[#allocation24_spill]] (!%p2410_p4) }
  0x4e   : > { %s4063_s9 = sld [smem:[#allocation29_spill]] (!%p2410_p4) }
  0x50   : > { %v727_v4 = vld [vmem:[%s3461_s27] sm:$0xff]  ;;  %vm731_vm0 = vcmask 523264   ;;  %v728_v6 = vld [vmem:[%s3461_s27 + $0x8] sm:$0xff]  ;;  %v3244_v8 = vmov 64.0   ;;  %vm845_vm8 = vcmask 125952  }
  0x51   : > { %v732_v5 = vsel %vm731_vm0, %v727_v4, 0.0  ;;  %v735_v7 = vsel %vm731_vm0, %v728_v6, 0.0  ;;  %3056 = vrcp.f32 %v3244_v8  ;;  %v2875_v25 = vld [vmem:[%s4060_s15 + $0x18] sm:$0xff]  ;;  %v2874_v29 = vld [vmem:[%s4060_s15 + $0x10] sm:$0xff]  ;;  %v2873_v33 = vld [vmem:[%s4060_s15 + $0x8] sm:$0xff] }
  0x52   : > { %733 = vadd.xlane.f32.xlu0 %v732_v5  ;;  %v2883_v27 = vld [vmem:[%s4060_s15 + $0x38] sm:$0xff]  ;;  %833 = vmatpush.bf16.msra.mxu0 %v2875_v25  ;;  %v2882_v31 = vld [vmem:[%s4060_s15 + $0x30] sm:$0xff]  ;;  %v2881_v35 = vld [vmem:[%s4060_s15 + $0x28] sm:$0xff] }
  0x53   : > { %v2879_v26 = vld [vmem:[%s4061_s4 + $0x18] sm:$0xff]  ;;  %939 = vmatpush.bf16.msra.mxu2 %v2883_v27  ;;  %v2878_v30 = vld [vmem:[%s4061_s4 + $0x10] sm:$0xff]  ;;  %v2877_v34 = vld [vmem:[%s4061_s4 + $0x8] sm:$0xff] }
  0x54   : > { %v2887_v28 = vld [vmem:[%s4061_s4 + $0x38] sm:$0xff]  ;;  %888 = vmatpush.bf16.msra.mxu1 %v2879_v26  ;;  %v2886_v32 = vld [vmem:[%s4061_s4 + $0x30] sm:$0xff]  ;;  %v2885_v36 = vld [vmem:[%s4061_s4 + $0x28] sm:$0xff] }
  0x55   : > { %996 = vmatpush.bf16.msra.mxu3 %v2887_v28  ;;  %v2872_v39 = vld [vmem:[%s4060_s15] sm:$0xff]  ;;  %v2903_v44 = vld [vmem:[%s4061_s4 + $0x78] sm:$0xff]  ;;  %v2902_v50 = vld [vmem:[%s4061_s4 + $0x70] sm:$0xff] }
  0x56   : > { %834 = vmatpush.bf16.msra.mxu0 %v2874_v29  ;;  %v2876_v40 = vld [vmem:[%s4061_s4] sm:$0xff]  ;;  %v2891_v45 = vld [vmem:[%s4060_s15 + $0x58] sm:$0xff]  ;;  %v2890_v51 = vld [vmem:[%s4060_s15 + $0x50] sm:$0xff] }
  0x57   : > { %v3057_v9 = vpop.eup %3056  ;;  %940 = vmatpush.bf16.msra.mxu2 %v2882_v31  ;;  %v2880_v41 = vld [vmem:[%s4060_s15 + $0x20] sm:$0xff]  ;;  %v2895_v46 = vld [vmem:[%s4061_s4 + $0x58] sm:$0xff]  ;;  %v2894_v52 = vld [vmem:[%s4061_s4 + $0x50] sm:$0xff] }
  0x58   : > { %v739_v10 = vmul.f32 64.0, %v3057_v9  ;;  %vm743_vm1 = vweird.f32 %v3057_v9  ;;  %889 = vmatpush.bf16.msra.mxu1 %v2878_v30  ;;  %v2884_v43 = vld [vmem:[%s4061_s4 + $0x20] sm:$0xff]  ;;  %v2899_v48 = vld [vmem:[%s4060_s15 + $0x78] sm:$0xff]  ;;  %v2898_v53 = vld [vmem:[%s4060_s15 + $0x70] sm:$0xff] }
  0x59   : > { %997 = vmatpush.bf16.msra.mxu3 %v2886_v32  ;;  %v2901_v57 = vld [vmem:[%s4061_s4 + $0x68] sm:$0xff]  ;;  %v2900_v63 = vld [vmem:[%s4061_s4 + $0x60] sm:$0xff] }
  0x5a   : > { %736 = vadd.xlane.f32.xlu0 %v735_v7  ;;  %v740_v11 = vsub.f32 1.0, %v739_v10  ;;  %835 = vmatpush.bf16.msra.mxu0 %v2873_v33  ;;  %v2889_v58 = vld [vmem:[%s4060_s15 + $0x48] sm:$0xff]  ;;  %v2888_v0 = vld [vmem:[%s4060_s15 + $0x40] sm:$0xff] }
  0x5b   : > { %941 = vmatpush.bf16.msra.mxu2 %v2881_v35  ;;  %v2893_v60 = vld [vmem:[%s4061_s4 + $0x48] sm:$0xff]  ;;  %v2892_v2 = vld [vmem:[%s4061_s4 + $0x40] sm:$0xff] }
  0x5c   : > { %v741_v12 = vmul.f32 %v3057_v9, %v740_v11  ;;  %890 = vmatpush.bf16.msra.mxu1 %v2877_v34  ;;  %v2897_v61 = vld [vmem:[%s4060_s15 + $0x68] sm:$0xff]  ;;  %v2896_v3 = vld [vmem:[%s4060_s15 + $0x60] sm:$0xff] }
  0x5d   : > { %998 = vmatpush.bf16.msra.mxu3 %v2885_v36  ;;  %v3050_v11 = vld [vmem:[%s4062_s8] ss:$0 sm:$0xff]  ;;  %v3053_v28 = vld [vmem:[%s4005_s11 + $0x1] ss:$0 sm:$0xff] }
  0x5e   : > { %v742_v13 = vadd.f32 %v3057_v9, %v741_v12  ;;  %836 = vmatpush.bf16.msra.mxu0 %v2872_v39  ;;  %v3054_v39 = vld [vmem:[%s4005_s11 + $0x2] ss:$0 sm:$0xff] }
  0x5f   : > { %942 = vmatpush.bf16.msra.mxu2 %v2880_v41 }
  0x60   : > { %v744_v14 = vsel %vm743_vm1, %v3057_v9, %v742_v13  ;;  %891 = vmatpush.bf16.msra.mxu1 %v2876_v40 }
  0x61   : > { %999 = vmatpush.bf16.msra.mxu3 %v2884_v43 }
  0x62   : > { %1048 = vmatpush.bf16.msrb.mxu0 %v2891_v45 }
  0x63   : > { %1157 = vmatpush.bf16.msrb.mxu2 %v2899_v48 }
  0x64   : > { %1105 = vmatpush.bf16.msrb.mxu1 %v2895_v46 }
  0x65   : > { %1214 = vmatpush.bf16.msrb.mxu3 %v2903_v44 }
  0x66   : > { %1049 = vmatpush.bf16.msrb.mxu0 %v2890_v51 }
  0x67   : > { %1158 = vmatpush.bf16.msrb.mxu2 %v2898_v53 }
  0x68   : > { %1106 = vmatpush.bf16.msrb.mxu1 %v2894_v52 }
  0x69   : > { %1215 = vmatpush.bf16.msrb.mxu3 %v2902_v50  ;;  %v3055_v50 = vld [vmem:[%s4005_s11 + $0x3] ss:$0 sm:$0xff] }
  0x6a   : > { %1050 = vmatpush.bf16.msrb.mxu0 %v2889_v58 }
  0x6b   : > { %1159 = vmatpush.bf16.msrb.mxu2 %v2897_v61 }
  0x6c   : > { %1107 = vmatpush.bf16.msrb.mxu1 %v2893_v60 }
  0x6d   : > { %1216 = vmatpush.bf16.msrb.mxu3 %v2901_v57 }
  0x6e   : > { %1051 = vmatpush.bf16.msrb.mxu0 %v2888_v0 }
  0x6f   : > { %1160 = vmatpush.bf16.msrb.mxu2 %v2896_v3 }
  0x70   : > { %1108 = vmatpush.bf16.msrb.mxu1 %v2892_v2 }
  0x71   : > { %1217 = vmatpush.bf16.msrb.mxu3 %v2900_v63 }
  0xc5   : > { %v734_v15 = vpop.xlane.xlu0 %733 }
  0xc6   : > { %v745_v16 = vmul.f32 %v744_v14, %v734_v15  ;;  %v3051_v15 = vld [vmem:[%s4063_s9] ss:$0 sm:$0xff] }
  0xc8   : > { %v3474_v17 = vsub.f32 %v727_v4, %v745_v16 }
  0xca   : > { %v749_v18 = vmul.f32 %v3474_v17, %v3474_v17 }
  0xcc   : > { %v751_v19 = vsel %vm731_vm0, %v749_v18, 0.0 }
  0xcd   : > { %752 = vadd.xlane.f32.xlu1 %v751_v19  ;;  %v737_v20 = vpop.xlane.xlu0 %736 }
  0xce   : > { %v746_v21 = vmul.f32 %v744_v14, %v737_v20 }
  0xd0   : > { %v3479_v22 = vsub.f32 %v728_v6, %v746_v21 }
  0xd2   : > { %v750_v23 = vmul.f32 %v3479_v22, %v3479_v22 }
  0xd4   : > { %v754_v24 = vsel %vm731_vm0, %v750_v23, 0.0 }
  0xd5   : > { %755 = vadd.xlane.f32.xlu1 %v754_v24 }
 0x140   : > { %v753_v37 = vpop.xlane.xlu1 %752 }
 0x141   : > { %v757_v38 = vmul.f32 %v753_v37, %v744_v14 }
 0x143   : > { %v759_v42 = vadd.f32 1e-05, %v757_v38 }
 0x145   : > { %3058 = vrsqrt.f32 %v759_v42  ;;  %vm767_vm3 = vweird.f32 %v759_v42 }
 0x148   : > { %v756_v47 = vpop.xlane.xlu1 %755 }
 0x149   : > { %v758_v49 = vmul.f32 %v756_v47, %v744_v14 }
 0x14b   : > { %v3059_v54 = vpop.eup %3058  ;;  %v760_v55 = vadd.f32 1e-05, %v758_v49 }
 0x14c   : > { %v762_v56 = vmul.f32 %v3059_v54, %v759_v42  ;;  %vm768_vm2 = vweird.f32 %v3059_v54 }
 0x14d   : > { %3060 = vrsqrt.f32 %v760_v55  ;;  %vm769_vm4 = vmor %vm767_vm3, %vm768_vm2  ;;  %vm777_vm6 = vweird.f32 %v760_v55 }
 0x14e   : > { %v763_v59 = vmul.f32 %v3059_v54, %v762_v56 }
 0x150   : > { %v764_v62 = vmul.f32 0.5, %v763_v59 }
 0x152   : > { %v765_v1 = vsub.f32 1.5, %v764_v62 }
 0x153   : > { %v3061_v4 = vpop.eup %3060 }
 0x154   : > { %v766_v5 = vmul.f32 %v3059_v54, %v765_v1  ;;  %v772_v6 = vmul.f32 %v3061_v4, %v760_v55  ;;  %vm778_vm5 = vweird.f32 %v3061_v4 }
 0x155   : > { %vm779_vm7 = vmor %vm777_vm6, %vm778_vm5 }
 0x156   : > { %v773_v7 = vmul.f32 %v3061_v4, %v772_v6  ;;  %v770_v8 = vsel %vm769_vm4, %v3059_v54, %v766_v5 }
 0x157   : > { %v781_v12 = vmul.f32 %v770_v8, %v3474_v17  ;;  %v3052_v17 = vld [vmem:[%s4005_s11] ss:$0 sm:$0xff] }
 0x158   : > { %v774_v9 = vmul.f32 0.5, %v773_v7 }
 0x159   : > { %v786_v16 = vmul.f32 %v3050_v11, %v781_v12 }
 0x15a   : > { %v775_v10 = vsub.f32 1.5, %v774_v9 }
 0x15b   : > { %v791_v20 = vadd.f32 %v3051_v15, %v786_v16 }
 0x15c   : > { %v776_v13 = vmul.f32 %v3061_v4, %v775_v10 }
 0x15e   : > { %v780_v14 = vsel %vm779_vm7, %v3061_v4, %v776_v13 }
 0x15f   : > { %v782_v18 = vmul.f32 %v780_v14, %v3479_v22 }
 0x161   : > { %v787_v19 = vmul.f32 %v3050_v11, %v782_v18 }
 0x163   : > { %v792_v21 = vadd.f32 %v3051_v15, %v787_v19 }
 0x165   : > { %v793_v23 = vpack.c.bf16 %v792_v21, %v791_v20 }
 0x167   : > { %2427 = vmatmul.msk.bf16.vlgmr.msra.gmra.mxu0 %vm731_vm0, %v793_v23  ;;  %2444 = vmatmul.msk.bf16.vlgmr.msra.gmra.mxu1 %vm731_vm0, %v793_v23 }
 0x168   : > { %2469 = vmatmul.msk.bf16.vlgmr.msra.gmra.mxu2 %vm731_vm0, %v793_v23  ;;  %2495 = vmatmul.msk.bf16.vlgmr.msra.gmra.mxu3 %vm731_vm0, %v793_v23 }
 0x177   : > { %2520 = vmatmul.msk.bf16.vlgmr.msrb.gmra.mxu0 %vm731_vm0, %v793_v23  ;;  %2546 = vmatmul.msk.bf16.vlgmr.msrb.gmra.mxu1 %vm731_vm0, %v793_v23 }
 0x178   : > { %2571 = vmatmul.msk.bf16.vlgmr.msrb.gmra.mxu2 %vm731_vm0, %v793_v23  ;;  %2597 = vmatmul.msk.bf16.vlgmr.msrb.gmra.mxu3 %vm731_vm0, %v793_v23 }
 0x1e4   : > { %v838_v22 = vpop.f32.mrf.mxu0  ;;  %v893_v24 = vpop.f32.mrf.mxu1 }
 0x1e5   : > { %v843_v25 = vpack.c.bf16 %v838_v22, %v838_v22  ;;  %v894_v26 = vadd.f32 %v3052_v17, %v893_v24 }
 0x1e7   : > { %846 = vst.msk [vmem:[#allocation2] sm:$0xf] %vm845_vm8, %v843_v25  ;;  %v898_v27 = vpack.c.bf16 %v894_v26, %v894_v26 }
 0x1e9   : > { %900 = vst.msk [vmem:[#allocation3] sm:$0xf] %vm845_vm8, %v898_v27 }
 0x1eb   : > { %v944_v29 = vpop.f32.mrf.mxu2  ;;  %v1001_v30 = vpop.f32.mrf.mxu3 }
 0x1ec   : > { %v949_v31 = vpack.c.bf16 %v944_v29, %v944_v29  ;;  %v1002_v32 = vadd.f32 %v3053_v28, %v1001_v30  ;;  %v840_v33 = vpop.f32.mrf.mxu0  ;;  %v895_v34 = vpop.f32.mrf.mxu1 }
 0x1ed   : > { %v844_v35 = vpack.c.bf16 %v840_v33, %v840_v33  ;;  %v896_v36 = vadd.f32 %v3052_v17, %v895_v34 }
 0x1ee   : > { %952 = vst.msk [vmem:[#allocation2 + $0x8] sm:$0xf] %vm845_vm8, %v949_v31  ;;  %v1006_v37 = vpack.c.bf16 %v1002_v32, %v1002_v32 }
 0x1ef   : > { %847 = vst.msk [vmem:[#allocation2 + $0x4] sm:$0xf] %vm845_vm8, %v844_v35  ;;  %v899_v38 = vpack.c.bf16 %v896_v36, %v896_v36 }
 0x1f0   : > { %1009 = vst.msk [vmem:[#allocation3 + $0x8] sm:$0xf] %vm845_vm8, %v1006_v37 }
 0x1f1   : > { %901 = vst.msk [vmem:[#allocation3 + $0x4] sm:$0xf] %vm845_vm8, %v899_v38 }
 0x1f3   : > { %v946_v40 = vpop.f32.mrf.mxu2  ;;  %v1003_v41 = vpop.f32.mrf.mxu3 }
 0x1f4   : > { %v950_v42 = vpack.c.bf16 %v946_v40, %v946_v40  ;;  %v1004_v43 = vadd.f32 %v3053_v28, %v1003_v41  ;;  %v1053_v44 = vpop.f32.mrf.mxu0  ;;  %v1110_v45 = vpop.f32.mrf.mxu1 }
 0x1f5   : > { %v1058_v46 = vpack.c.bf16 %v1053_v44, %v1053_v44  ;;  %v1111_v47 = vadd.f32 %v3054_v39, %v1110_v45 }
 0x1f6   : > { %953 = vst.msk [vmem:[#allocation2 + $0xc] sm:$0xf] %vm845_vm8, %v950_v42  ;;  %v1007_v48 = vpack.c.bf16 %v1004_v43, %v1004_v43 }
 0x1f7   : > { %1061 = vst.msk [vmem:[#allocation2 + $0x10] sm:$0xf] %vm845_vm8, %v1058_v46  ;;  %v1115_v49 = vpack.c.bf16 %v1111_v47, %v1111_v47 }
 0x1f8   : > { %1010 = vst.msk [vmem:[#allocation3 + $0xc] sm:$0xf] %vm845_vm8, %v1007_v48 }
 0x1f9   : > { %1118 = vst.msk [vmem:[#allocation3 + $0x10] sm:$0xf] %vm845_vm8, %v1115_v49 }
 0x1fb   : > { %v1162_v51 = vpop.f32.mrf.mxu2  ;;  %v1219_v52 = vpop.f32.mrf.mxu3 }
 0x1fc   : > { %v1167_v53 = vpack.c.bf16 %v1162_v51, %v1162_v51  ;;  %v1220_v54 = vadd.f32 %v3055_v50, %v1219_v52  ;;  %v1055_v55 = vpop.f32.mrf.mxu0  ;;  %v1112_v56 = vpop.f32.mrf.mxu1 }
 0x1fd   : > { %v1059_v57 = vpack.c.bf16 %v1055_v55, %v1055_v55  ;;  %v1113_v58 = vadd.f32 %v3054_v39, %v1112_v56 }
 0x1fe   : > { %1170 = vst.msk [vmem:[#allocation2 + $0x18] sm:$0xf] %vm845_vm8, %v1167_v53  ;;  %v1224_v59 = vpack.c.bf16 %v1220_v54, %v1220_v54 }
 0x1ff   : > { %1062 = vst.msk [vmem:[#allocation2 + $0x14] sm:$0xf] %vm845_vm8, %v1059_v57  ;;  %v1116_v60 = vpack.c.bf16 %v1113_v58, %v1113_v58 }
 0x200   : > { %1227 = vst.msk [vmem:[#allocation3 + $0x18] sm:$0xf] %vm845_vm8, %v1224_v59 }
 0x201   : > { %1119 = vst.msk [vmem:[#allocation3 + $0x14] sm:$0xf] %vm845_vm8, %v1116_v60 }
 0x203   : > { %v1164_v61 = vpop.f32.mrf.mxu2  ;;  %v1221_v62 = vpop.f32.mrf.mxu3 }
 0x204   : > { %v1168_v63 = vpack.c.bf16 %v1164_v61, %v1164_v61  ;;  %v1222_v0 = vadd.f32 %v3055_v50, %v1221_v62 }
 0x206   : > { %1171 = vst.msk [vmem:[#allocation2 + $0x1c] sm:$0xf] %vm845_vm8, %v1168_v63  ;;  %v1225_v1 = vpack.c.bf16 %v1222_v0, %v1222_v0 }
 0x208   : > { %1228 = vst.msk [vmem:[#allocation3 + $0x1c] sm:$0xf] %vm845_vm8, %v1225_v1 }
 0x209 PF: > { %s2598_s14 = sshll.u32 %s3226_s25, 3  ;;  %vm1234_vm9 = vcmask 523264   ;;  %v3245_v4 = vmov 64.0   ;;  %s4064_s23 = sld [smem:[#allocation22_spill]]  ;;  %v2908_v21 = vld [vmem:[#allocation2] sm:$0xff]  ;;  %vm1334_vm11 = vcmask 130048  }
 0x20a   : > { %s1230_s20 = scalar_lea.vmem %s3461_s27, %s2598_s14  ;;  %3074 = vrcp.f32 %v3245_v4  ;;  %v1339_v22 = vsel %vm1334_vm11, %v2908_v21, 0  ;;  %s4066_s8 = sld [smem:[#allocation28_spill]]  ;;  %v3064_v42 = vld [vmem:[%s4004_s10] ss:$0 sm:$0xff]  ;;  %v2915_v60 = vld [vmem:[#allocation2 + $0x8] sm:$0xff] }
 0x20b   : > { %v3626_v2 = vld [vmem:[%s1230_s20] sm:$0xff]  ;;  %1348 = vmatpush.bf16.xpose.msra.mxu1 %v1339_v22  ;;  %s4067_s9 = sld [smem:[#allocation29_spill]]  ;;  %v1459_v61 = vsel %vm1334_vm11, %v2915_v60, 0  ;;  %s2252_s27 = sshll.u32 %s3465_s16, 4  ;;  %s3929_s27 = int_to_ptr.vmem [resolvable:$true] %s2252_s27 }
 0x20c   : > { %v1235_v3 = vsel %vm1234_vm9, %v3626_v2, 0.0  ;;  %v1328_v47 = vld [vmem:[%s3463_s26] sm:$0xff]  ;;  %s4068_s5 = sld [smem:[#allocation25_spill]] }
 0x20d   : > { %1236 = vadd.xlane.f32.xlu0 %v1235_v3  ;;  %v2909_v59 = vld [vmem:[#allocation3] sm:$0xff]  ;;  %s4069_s6 = sld [smem:[#allocation26_spill]] }
 0x20e   : > { %1384 = vmatpush.bf16.msra.mxu2 %v2909_v59  ;;  %v3065_v3 = vld [vmem:[%s4004_s10 + $0x1] ss:$0 sm:$0xff]  ;;  %s4070_s29 = sld [smem:[#allocation30_spill]] }
 0x20f   : > { %s4065_s18 = smov %s4064_s23  ;;  %v2907_v16 = vld [vmem:[%s4064_s23 + $0x18] sm:$0xff]  ;;  %s4071_s20 = sld [smem:[#allocation31_spill]] }
 0x210   : > { %v3075_v5 = vpop.eup %3074  ;;  %1316 = vmatpush.bf16.msra.mxu0 %v2907_v16  ;;  %v2906_v18 = vld [vmem:[%s4065_s18 + $0x10] sm:$0xff]  ;;  %v2905_v19 = vld [vmem:[%s4065_s18 + $0x8] sm:$0xff]  ;;  %v2904_v20 = vld [vmem:[%s4065_s18] sm:$0xff]  ;;  %s4072_s23 = sld [smem:[#allocation27_spill]] }
 0x211   : > { %v1239_v6 = vmul.f32 64.0, %v3075_v5  ;;  %vm1243_vm10 = vweird.f32 %v3075_v5  ;;  %v3062_v31 = vld [vmem:[%s4066_s8] ss:$0 sm:$0xff]  ;;  %v2914_v38 = vld [vmem:[%s4065_s18 + $0x38] sm:$0xff]  ;;  %v2913_v39 = vld [vmem:[%s4065_s18 + $0x30] sm:$0xff]  ;;  %s4074_s21 = sld [smem:[#allocation32_spill]] }
 0x212   : > { %v3063_v34 = vld [vmem:[%s4067_s9] ss:$0 sm:$0xff]  ;;  %v2912_v40 = vld [vmem:[%s4065_s18 + $0x28] sm:$0xff]  ;;  %1468 = vmatpush.bf16.xpose.msrb.mxu2 %v1459_v61  ;;  %v2745_v61 = vld [vmem:[%s3463_s26 + $0x18] sm:$0xff]  ;;  %s4075_s22 = sld [smem:[#allocation33_spill]]  ;;  %s2268_s9 = sshll.u32 %s3467_s2, 4  ;;  %s2269_s9 = int_to_ptr.vmem [resolvable:$true] %s2268_s9 }
 0x213   : > { %v1240_v7 = vsub.f32 1.0, %v1239_v6  ;;  %1435 = vmatpush.bf16.msrb.mxu1 %v2914_v38  ;;  %v2911_v41 = vld [vmem:[%s4065_s18 + $0x20] sm:$0xff]  ;;  %s4076_s0 = sld [smem:[#allocation36_spill]] }
 0x214   : > { %1317 = vmatpush.bf16.msra.mxu0 %v2906_v18  ;;  %v2910_v21 = vld [vmem:[%s4068_s5] sm:$0xff] }
 0x215   : > { %v1241_v8 = vmul.f32 %v3075_v5, %v1240_v7  ;;  %v2925_v38 = vld [vmem:[%s4065_s18 + $0x60] sm:$0xff] }
 0x216   : > { %s4073_s19 = smov %s4072_s23 }
 0x217   : > { %v1242_v9 = vadd.f32 %v3075_v5, %v1241_v8  ;;  %1436 = vmatpush.bf16.msrb.mxu1 %v2913_v39  ;;  %v2652_v8 = vld [vmem:[%s3463_s26 + $0x8] sm:$0xff] }
 0x218   : > { %1318 = vmatpush.bf16.msra.mxu0 %v2905_v19 }
 0x219   : > { %v3630_v10 = vsel %vm1243_vm10, %v3075_v5, %v1242_v9 }
 0x21b   : > { %1437 = vmatpush.bf16.msrb.mxu1 %v2912_v40 }
 0x21c   : > { %1319 = vmatpush.bf16.msra.mxu0 %v2904_v20  ;;  %v2916_v20 = vld [vmem:[#allocation3 + $0x8] sm:$0xff] }
 0x21d   : > { %1505 = vmatpush.bf16.msra.mxu3 %v2916_v20 }
 0x21f   : > { %1438 = vmatpush.bf16.msrb.mxu1 %v2911_v41  ;;  %v2922_v41 = vld [vmem:[#allocation2 + $0x10] sm:$0xff] }
 0x221   : > { %1553 = vmatpush.bf16.msrb.mxu3 %v2910_v21 }
 0x280   : > { %v1237_v11 = vpop.xlane.xlu0 %1236 }
 0x281   : > { %v1245_v12 = vmul.f32 %v3630_v10, %v1237_v11 }
 0x283   : > { %v1246_v13 = vsub.f32 %v3626_v2, %v1245_v12 }
 0x285   : > { %v1247_v14 = vmul.f32 %v1246_v13, %v1246_v13 }
 0x287   : > { %v1248_v15 = vsel %vm1234_vm9, %v1247_v14, 0.0 }
 0x288   : > { %1249 = vadd.xlane.f32.xlu0 %v1248_v15 }
 0x2fb   : > { %v1250_v23 = vpop.xlane.xlu0 %1249 }
 0x2fc   : > { %v1251_v17 = vmul.f32 %v1250_v23, %v3630_v10  ;;  %v2917_v23 = vld [vmem:[%s4068_s5 + $0x8] sm:$0xff] }
 0x2fe   : > { %v1252_v24 = vadd.f32 1e-05, %v1251_v17 }
 0x300   : > { %3076 = vrsqrt.f32 %v1252_v24  ;;  %vm1259_vm13 = vweird.f32 %v1252_v24 }
 0x306   : > { %v3077_v25 = vpop.eup %3076 }
 0x307   : > { %v1254_v26 = vmul.f32 %v3077_v25, %v1252_v24  ;;  %vm1260_vm12 = vweird.f32 %v3077_v25 }
 0x308   : > { %vm1261_vm14 = vmor %vm1259_vm13, %vm1260_vm12 }
 0x309   : > { %v1255_v27 = vmul.f32 %v3077_v25, %v1254_v26 }
 0x30b   : > { %v1256_v28 = vmul.f32 0.5, %v1255_v27  ;;  %v2921_v27 = vld [vmem:[%s4065_s18 + $0x58] sm:$0xff] }
 0x30d   : > { %v1257_v29 = vsub.f32 1.5, %v1256_v28  ;;  %v2920_v28 = vld [vmem:[%s4065_s18 + $0x50] sm:$0xff] }
 0x30f   : > { %v1258_v30 = vmul.f32 %v3077_v25, %v1257_v29  ;;  %v2919_v29 = vld [vmem:[%s4065_s18 + $0x48] sm:$0xff] }
 0x311   : > { %v1262_v32 = vsel %vm1261_vm14, %v3077_v25, %v1258_v30  ;;  %v2918_v30 = vld [vmem:[%s4065_s18 + $0x40] sm:$0xff] }
 0x312   : > { %v1263_v33 = vmul.f32 %v1262_v32, %v1246_v13  ;;  %v2928_v32 = vld [vmem:[%s4065_s18 + $0x78] sm:$0xff] }
 0x314   : > { %v1267_v35 = vmul.f32 %v3062_v31, %v1263_v33 }
 0x316   : > { %v1271_v36 = vadd.f32 %v3063_v34, %v1267_v35  ;;  %v2927_v34 = vld [vmem:[%s4065_s18 + $0x70] sm:$0xff] }
 0x318   : > { %v3655_v37 = vpack.c.bf16 %v1271_v36, %v1271_v36  ;;  %v2926_v36 = vld [vmem:[%s4065_s18 + $0x68] sm:$0xff] }
 0x31a   : > { %2615 = vmatmul.msk.bf16.vlgmr.msra.gmra.mxu0 %vm1234_vm9, %v3655_v37 }
 0x397   : > { %v1321_v43 = vpop.f32.mrf.mxu0 }
 0x398   : > { %v1322_v44 = vadd.f32 %v3064_v42, %v1321_v43  ;;  %v1625_v42 = vsel %vm1334_vm11, %v2922_v41, 0  ;;  %v2929_v43 = vld [vmem:[#allocation2 + $0x18] sm:$0xff]  ;;  %v3069_v41 = vld [vmem:[%s4011_s17] ss:$0 sm:$0xff] }
 0x39a   : > { %v1325_v45 = vpack.c.bf16 %v1322_v44, %v1322_v44  ;;  %v1770_v44 = vsel %vm1334_vm11, %v2929_v43, 0 }
 0x39c   : > { %2620 = vmatmul.msk.bf16.vlgmr.msra.gmra.mxu1 %vm1334_vm11, %v1325_v45 }
 0x39d   : > { %1634 = vmatpush.bf16.xpose.msra.mxu1 %v1625_v42 }
 0x39f   : > { %v1323_v46 = vpop.f32.mrf.mxu0 }
 0x3ac   : > { %2651 = vmatmul.msk.bf16.vlgmr.msrb.gmra.mxu1 %vm1234_vm9, %v3655_v37 }
 0x3ad   : > { %1779 = vmatpush.bf16.xpose.msrb.mxu1 %v1770_v44 }
 0x419   : > { %v1350_v48 = vpop.f32.mrf.mxu1 }
 0x41a   : > { %v1351_v49 = vadd.f32 %v1350_v48, %v1328_v47  ;;  %v3066_v47 = vld [vmem:[%s4004_s10 + $0x2] ss:$0 sm:$0xff] }
 0x41c   : > { %v1354_v50 = vsel %vm1334_vm11, %v1351_v49, -inf }
 0x41d   : > { %1355 = vmax.xlane.f32.xlu1 %v1354_v50 }
 0x421   : > { %v1352_v51 = vpop.f32.mrf.mxu1 }
 0x422   : > { %v3067_v51 = vld [vmem:[%s4004_s10 + $0x3] ss:$0 sm:$0xff] }
 0x429   : > { %v1440_v52 = vpop.f32.mrf.mxu1 }
 0x42a   : > { %v1441_v4 = vadd.f32 %v3065_v3, %v1440_v52  ;;  %v2923_v3 = vld [vmem:[#allocation3 + $0x10] sm:$0xff] }
 0x42b   : > { %1671 = vmatpush.bf16.msrb.mxu0 %v2923_v3 }
 0x42c   : > { %v1444_v5 = vpack.c.bf16 %v1441_v4, %v1441_v4 }
 0x431   : > { %v1442_v53 = vpop.f32.mrf.mxu1 }
 0x490   : > { %v1356_v54 = vpop.xlane.xlu1 %1355 }
 0x491   : > { %v1357_v55 = vsub.f32 %v1351_v49, %v1356_v54 }
 0x493   : > { %v1358_v56 = vmul.f32 1.442695, %v1357_v55 }
 0x495   : > { %3078 = vpow2.f32 %v1358_v56  ;;  %v2701_v56 = vld [vmem:[%s3463_s26 + $0x10] sm:$0xff] }
 0x49b   : > { %v3079_v57 = vpop.eup %3078 }
 0x49c   : > { %v1360_v58 = vsel %vm1334_vm11, %v3079_v57, 0.0 }
 0x49d   : > { %1361 = vadd.xlane.f32.xlu1 %v1360_v58 }
 0x510   : > { %v1362_v62 = vpop.xlane.xlu1 %1361 }
 0x511   : > { %3080 = vrcp.f32 %v1362_v62 }
 0x517   : > { %v3081_v63 = vpop.eup %3080 }
 0x518   : > { %v1364_v0 = vmul.f32 %v3081_v63, %v3079_v57 }
 0x51a   : > { %v1365_v1 = vpack.c.bf16 %v1364_v0, %v1364_v0 }
 0x51c   : > { %2625 = vmatmul.msk.bf16.vlgmr.msra.gmra.mxu2 %vm1334_vm11, %v1365_v1 }
 0x51d   : > { %1531 = vmatpush.bf16.msra.mxu2 %v2917_v23 }
 0x52c   : > { %2657 = vmatmul.msk.bf16.vlgmr.msrb.gmra.mxu2 %vm1334_vm11, %v1444_v5 }
 0x52d   : > { %1601 = vmatpush.bf16.msrb.mxu2 %v2921_v27 }
 0x531   : > { %1602 = vmatpush.bf16.msrb.mxu2 %v2920_v28 }
 0x535   : > { %1603 = vmatpush.bf16.msrb.mxu2 %v2919_v29 }
 0x539   : > { %1604 = vmatpush.bf16.msrb.mxu2 %v2918_v30 }
 0x59f   : > { %v1386_v6 = vpop.f32.mrf.mxu2 }
 0x5a0   : > { %v1390_v26 = vpack.c.bf16 %v1386_v6, %v1386_v6 }
 0x5a7   : > { %v1388_v7 = vpop.f32.mrf.mxu2 }
 0x5af   : > { %v1470_v9 = vpop.f32.mrf.mxu2 }
 0x5b0   : > { %v1471_v11 = vadd.f32 %v2652_v8, %v1470_v9 }
 0x5b2   : > { %v1474_v12 = vsel %vm1334_vm11, %v1471_v11, -inf }
 0x5b3   : > { %1475 = vmax.xlane.f32.xlu2 %v1474_v12 }
 0x5b7   : > { %v1472_v13 = vpop.f32.mrf.mxu2 }
 0x626   : > { %v1476_v14 = vpop.xlane.xlu2 %1475 }
 0x627   : > { %v1477_v15 = vsub.f32 %v1471_v11, %v1476_v14 }
 0x629   : > { %v1478_v16 = vmul.f32 1.442695, %v1477_v15  ;;  %v2930_v15 = vld [vmem:[#allocation3 + $0x18] sm:$0xff] }
 0x62a   : > { %1816 = vmatpush.bf16.msra.mxu0 %v2930_v15 }
 0x62b   : > { %3082 = vpow2.f32 %v1478_v16  ;;  %v2924_v16 = vld [vmem:[%s4068_s5 + $0x10] sm:$0xff] }
 0x631   : > { %v3083_v18 = vpop.eup %3082 }
 0x632   : > { %v1480_v19 = vsel %vm1334_vm11, %v3083_v18, 0.0 }
 0x633   : > { %1481 = vadd.xlane.f32.xlu2 %v1480_v19 }
 0x6a6   : > { %v1482_v17 = vpop.xlane.xlu2 %1481 }
 0x6a7   : > { %3084 = vrcp.f32 %v1482_v17 }
 0x6ad   : > { %v3085_v22 = vpop.eup %3084 }
 0x6ae   : > { %v1484_v24 = vmul.f32 %v3085_v22, %v3083_v18 }
 0x6b0   : > { %v1485_v25 = vpack.c.bf16 %v1484_v24, %v1484_v24 }
 0x6b2   : > { %2662 = vmatmul.msk.bf16.vlgmr.msra.gmra.mxu3 %vm1334_vm11, %v1485_v25  ;;  %v2931_v25 = vld [vmem:[%s4068_s5 + $0x18] sm:$0xff]  ;;  %s2238_s5 = scalar_lea.sflag [#allocation8], %s3453_s7 }
 0x6b3   : > { %1697 = vmatpush.bf16.msra.mxu3 %v2924_v16 }
 0x6c2   : > { %2674 = vmatmul.msk.bf16.vlgmr.msrb.gmra.mxu3 %vm1334_vm11, %v1390_v26 }
 0x6c3   : > { %1842 = vmatpush.bf16.msrb.mxu3 %v2931_v25 }
 0x735   : > { %v1507_v31 = vpop.f32.mrf.mxu3 }
 0x736   : > { %v1511_v33 = vpack.c.bf16 %v1507_v31, %v1507_v31 }
 0x738   : > { %2669 = vmatmul.msk.bf16.vlgmr.msra.gmra.mxu2 %vm1334_vm11, %v1511_v33 }
 0x739   : > { %1746 = vmatpush.bf16.msra.mxu2 %v2928_v32 }
 0x73d   : > { %v1509_v35 = vpop.f32.mrf.mxu3  ;;  %1747 = vmatpush.bf16.msra.mxu2 %v2927_v34 }
 0x741   : > { %1748 = vmatpush.bf16.msra.mxu2 %v2926_v36  ;;  %v3068_v36 = vld [vmem:[%s4006_s12] ss:$0 sm:$0xff] }
 0x745   : > { %v3722_v39 = vpop.f32.mrf.mxu3  ;;  %1749 = vmatpush.bf16.msra.mxu2 %v2925_v38 }
 0x748   : > { %2700 = vmatmul.msk.bf16.vlgmr.msrb.gmra.mxu2 %vm1234_vm9, %v3655_v37 }
 0x74d   : > { %v1557_v40 = vpop.f32.mrf.mxu3 }
 0x758   : > { %2744 = vmatmul.msk.bf16.vlgmr.msra.gmra.mxu2 %vm1234_vm9, %v3655_v37 }
 0x7bb   : > { %v3730_v45 = vpop.f32.mrf.mxu2 }
 0x7bc   : > { %v1556_v34 = vadd.f32 %v3722_v39, %v3730_v45 }
 0x7c3   : > { %v1535_v46 = vpop.f32.mrf.mxu2 }
 0x7cb   : > { %v1606_v48 = vpop.f32.mrf.mxu2 }
 0x7cc   : > { %v1607_v49 = vadd.f32 %v3066_v47, %v1606_v48 }
 0x7ce   : > { %v1610_v37 = vpack.c.bf16 %v1607_v49, %v1607_v49 }
 0x7d0   : > { %2706 = vmatmul.msk.bf16.vlgmr.msra.gmra.mxu1 %vm1334_vm11, %v1610_v37 }
 0x7d3   : > { %v1608_v50 = vpop.f32.mrf.mxu2 }
 0x7d4   : > { %v2789_v50 = vld [vmem:[%s4069_s6 + $0x30] sm:$0xf] }
 0x7db   : > { %v1751_v52 = vpop.f32.mrf.mxu2 }
 0x7dc   : > { %v1752_v53 = vadd.f32 %v3067_v51, %v1751_v52  ;;  %v2938_v51 = vld [vmem:[%s4069_s6 + $0x34] sm:$0xf] }
 0x7de   : > { %v1755_v54 = vpack.c.bf16 %v1752_v53, %v1752_v53  ;;  %v2791_v53 = vld [vmem:[%s4069_s6 + $0x38] sm:$0xf0] }
 0x7e0   : > { %2750 = vmatmul.msk.bf16.vlgmr.msrb.gmra.mxu1 %vm1334_vm11, %v1755_v54  ;;  %v2794_v54 = vor.u32 %v2938_v51, %v2791_v53 }
 0x7e2   : > { %1967 = vmatpush.bf16.msra.mxu1 %v2794_v54  ;;  %v2950_v54 = vld [vmem:[%s4073_s19 + $0x50] sm:$0xff] }
 0x7e3   : > { %v1753_v55 = vpop.f32.mrf.mxu2 }
 0x7e4   : > { %v2781_v55 = vld [vmem:[%s4069_s6 + $0x20] sm:$0xf] }
 0x84d   : > { %v1636_v57 = vpop.f32.mrf.mxu1 }
 0x84e   : > { %v1637_v58 = vadd.f32 %v2701_v56, %v1636_v57  ;;  %v2937_v56 = vld [vmem:[%s4069_s6 + $0x24] sm:$0xf0]  ;;  %v2936_v57 = vld [vmem:[%s4069_s6 + $0x24] sm:$0xf] }
 0x850   : > { %v1640_v59 = vsel %vm1334_vm11, %v1637_v58, -inf }
 0x851   : > { %1641 = vmax.xlane.f32.xlu0 %v1640_v59  ;;  %v2783_v59 = vld [vmem:[%s4069_s6 + $0x28] sm:$0xf0] }
 0x855   : > { %v1638_v60 = vpop.f32.mrf.mxu1 }
 0x856   : > { %v2786_v60 = vor.u32 %v2936_v57, %v2783_v59 }
 0x858   : > { %1968 = vmatpush.bf16.msra.mxu1 %v2786_v60 }
 0x85d   : > { %v1781_v62 = vpop.f32.mrf.mxu1 }
 0x85e   : > { %v1782_v63 = vadd.f32 %v2745_v61, %v1781_v62  ;;  %v2773_v61 = vld [vmem:[%s4069_s6 + $0x10] sm:$0xf]  ;;  %v2935_v62 = vld [vmem:[%s4069_s6 + $0x14] sm:$0xf0] }
 0x860   : > { %v1785_v0 = vsel %vm1334_vm11, %v1782_v63, -inf }
 0x861   : > { %1786 = vmax.xlane.f32.xlu1 %v1785_v0  ;;  %v2774_v0 = vor.u32 %v2935_v62, %v2773_v61 }
 0x865   : > { %v1783_v1 = vpop.f32.mrf.mxu1 }
 0x866   : > { %v2775_v1 = vld [vmem:[%s4069_s6 + $0x18] sm:$0xf0] }
 0x8c4   : > { %v1642_v4 = vpop.xlane.xlu0 %1641 }
 0x8c5   : > { %v1643_v5 = vsub.f32 %v1637_v58, %v1642_v4  ;;  %v2782_v58 = vor.u32 %v2937_v56, %v2781_v55  ;;  %v2765_v4 = vld [vmem:[%s4069_s6] sm:$0xf] }
 0x8c7   : > { %v1644_v6 = vmul.f32 1.442695, %v1643_v5  ;;  %v2933_v5 = vld [vmem:[%s4069_s6 + $0x4] sm:$0xf0] }
 0x8c9   : > { %3086 = vpow2.f32 %v1644_v6  ;;  %v2932_v6 = vld [vmem:[%s4069_s6 + $0x4] sm:$0xf] }
 0x8cf   : > { %v3087_v7 = vpop.eup %3086 }
 0x8d0   : > { %v1646_v8 = vsel %vm1334_vm11, %v3087_v7, 0.0 }
 0x8d1   : > { %1647 = vadd.xlane.f32.xlu2 %v1646_v8  ;;  %v2767_v8 = vld [vmem:[%s4069_s6 + $0x8] sm:$0xf0] }
 0x8d4   : > { %v1787_v9 = vpop.xlane.xlu1 %1786 }
 0x8d5   : > { %v1788_v11 = vsub.f32 %v1782_v63, %v1787_v9  ;;  %v2934_v63 = vld [vmem:[%s4069_s6 + $0x14] sm:$0xf]  ;;  %v2770_v9 = vor.u32 %v2932_v6, %v2767_v8 }
 0x8d6   : > { %v2778_v3 = vor.u32 %v2934_v63, %v2775_v1  ;;  %v2949_v63 = vld [vmem:[%s4073_s19 + $0x48] sm:$0xff] }
 0x8d7   : > { %v1789_v12 = vmul.f32 1.442695, %v1788_v11 }
 0x8d8   : > { %1969 = vmatpush.bf16.msra.mxu1 %v2778_v3 }
 0x8d9   : > { %3088 = vpow2.f32 %v1789_v12 }
 0x8dc   : > { %1970 = vmatpush.bf16.msra.mxu1 %v2770_v9  ;;  %v2948_v9 = vld [vmem:[%s4073_s19 + $0x40] sm:$0xff] }
 0x8df   : > { %v3089_v13 = vpop.eup %3088 }
 0x8e0   : > { %v1791_v14 = vsel %vm1334_vm11, %v3089_v13, 0.0 }
 0x8e1   : > { %1792 = vadd.xlane.f32.xlu0 %v1791_v14 }
 0x944   : > { %v1648_v18 = vpop.xlane.xlu2 %1647 }
 0x945   : > { %3090 = vrcp.f32 %v1648_v18 }
 0x94b   : > { %v3091_v19 = vpop.eup %3090 }
 0x94c   : > { %v1650_v20 = vmul.f32 %v3091_v19, %v3087_v7  ;;  %v2766_v7 = vor.u32 %v2933_v5, %v2765_v4  ;;  %v2942_v4 = vld [vmem:[%s4073_s19 + $0x10] sm:$0xff] }
 0x94e   : > { %v1651_v21 = vpack.c.bf16 %v1650_v20, %v1650_v20 }
 0x950   : > { %2711 = vmatmul.msk.bf16.vlgmr.msrb.gmra.mxu0 %vm1334_vm11, %v1651_v21  ;;  %v3070_v21 = vld [vmem:[%s4070_s29] ss:$0 sm:$0xff]  ;;  %s2865_s29 = sshll.u32 %s3230_s3, 1 }
 0x951   : > { %s2248_s14 = sadd.s32 %s3226_s25, %s2865_s29  ;;  %s4078_s25 = sld [smem:[#allocation35_spill]] }
 0x952   : > { %s2866_s26 = sshll.u32 %s2248_s14, 3 }
 0x954   : > { %v1793_v23 = vpop.xlane.xlu0 %1792 }
 0x955   : > { %3092 = vrcp.f32 %v1793_v23 }
 0x957   : > { %s4079_s29 = smov %s4078_s25  ;;  %s2250_s14 = scalar_lea.hbm %s4078_s25, %s2866_s26 }
 0x95b   : > { %v3093_v17 = vpop.eup %3092 }
 0x95c   : > { %v1795_v22 = vmul.f32 %v3093_v17, %v3089_v13 }
 0x95e   : > { %v1796_v24 = vpack.c.bf16 %v1795_v22, %v1795_v22 }
 0x960   : > { %2755 = vmatmul.msk.bf16.vlgmr.msra.gmra.mxu0 %vm1334_vm11, %v1796_v24 }
 0x9cd   : > { %v1673_v26 = vpop.f32.mrf.mxu0 }
 0x9ce   : > { %v1677_v27 = vpack.c.bf16 %v1673_v26, %v1673_v26  ;;  %v2955_v26 = vld [vmem:[%s4072_s23 + $0x78] sm:$0xff]  ;;  %s3120_s23 = scalar_lea.hbm %s4076_s0, 32 }
 0x9d0   : > { %2718 = vmatmul.msk.bf16.vlgmr.msra.gmra.mxu3 %vm1334_vm11, %v1677_v27  ;;  %v1901_v27 = vld [vmem:[%s4074_s21] sm:$0x3]  ;;  %s2266_s21 = scalar_lea.hbm %s4076_s0, %s2866_s26 }
 0x9d1   : > { %2211 = vmatpush.bf16.msra.mxu3 %v2955_v26 }
 0x9d5   : > { %v1675_v28 = vpop.f32.mrf.mxu0 }
 0x9d6   : > { %v1904_v28 = vperm.slane %v1901_v27, 1 }
 0x9dd   : > { %v1818_v29 = vpop.f32.mrf.mxu0 }
 0x9de   : > { %v1822_v30 = vpack.c.bf16 %v1818_v29, %v1818_v29  ;;  %v2954_v29 = vld [vmem:[%s4073_s19 + $0x70] sm:$0xff] }
 0x9df   : > { %2212 = vmatpush.bf16.msra.mxu3 %v2954_v29 }
 0x9e0   : > { %2762 = vmatmul.msk.bf16.vlgmr.msrb.gmra.mxu3 %vm1334_vm11, %v1822_v30  ;;  %v2947_v30 = vld [vmem:[%s4073_s19 + $0x38] sm:$0xff] }
 0x9e1   : > { %2198 = vmatpush.bf16.msrb.mxu0 %v2947_v30 }
 0x9e5   : > { %v1820_v31 = vpop.f32.mrf.mxu0 }
 0xa53   : > { %v1699_v32 = vpop.f32.mrf.mxu3 }
 0xa54   : > { %v1703_v35 = vadd.f32 %v1699_v32, %v1556_v34 }
 0xa5b   : > { %v1701_v33 = vpop.f32.mrf.mxu3 }
 0xa5c   : > { %v2953_v33 = vld [vmem:[%s4073_s19 + $0x68] sm:$0xff] }
 0xa5d   : > { %2213 = vmatpush.bf16.msra.mxu3 %v2953_v33 }
 0xa63   : > { %v1844_v38 = vpop.f32.mrf.mxu3 }
 0xa64   : > { %v1848_v40 = vadd.f32 %v1844_v38, %v1703_v35  ;;  %v1903_v35 = vperm.slane %v1901_v27, 0 }
 0xa66   : > { %v1853_v42 = vadd.f32 %v3068_v36, %v1848_v40  ;;  %v2946_v36 = vld [vmem:[%s4073_s19 + $0x30] sm:$0xff]  ;;  %v2952_v40 = vld [vmem:[%s4073_s19 + $0x60] sm:$0xff] }
 0xa67   : > { %2199 = vmatpush.bf16.msrb.mxu0 %v2946_v36  ;;  %2214 = vmatpush.bf16.msra.mxu3 %v2952_v40 }
 0xa68   : > { %v1858_v43 = vmul.f32 %v3069_v41, %v1853_v42 }
 0xa6a   : > { %v3765_v44 = vadd.f32 %v1858_v43, %v3626_v2  ;;  %v2939_v2 = vld [vmem:[%s4069_s6 + $0x34] sm:$0xf0]  ;;  %s4077_s6 = sld [smem:[#allocation34_spill]] }
 0xa6b   : > { %v1846_v46 = vpop.f32.mrf.mxu3  ;;  %v2790_v52 = vor.u32 %v2939_v2, %v2789_v50  ;;  %v2944_v2 = vld [vmem:[%s4073_s19 + $0x20] sm:$0xff] }
 0xa6c   : > { %v1862_v39 = vsel %vm1234_vm9, %v3765_v44, 0.0  ;;  %v2945_v46 = vld [vmem:[%s4073_s19 + $0x28] sm:$0xff] }
 0xa6d   : > { %1863 = vadd.xlane.f32.xlu1 %v1862_v39  ;;  %1954 = vmatpush.bf16.msrb.mxu2 %v2790_v52 }
 0xa6e   : > { %2200 = vmatpush.bf16.msrb.mxu0 %v2945_v46 }
 0xa71   : > { %1955 = vmatpush.bf16.msrb.mxu2 %v2782_v58  ;;  %v2943_v58 = vld [vmem:[%s4073_s19 + $0x18] sm:$0xff] }
 0xa72   : > { %2201 = vmatpush.bf16.msrb.mxu0 %v2944_v2 }
 0xa75   : > { %1956 = vmatpush.bf16.msrb.mxu2 %v2774_v0 }
 0xa76   : > { %2202 = vmatpush.bf16.msrb.mxu0 %v2943_v58 }
 0xa79   : > { %1957 = vmatpush.bf16.msrb.mxu2 %v2766_v7 }
 0xa7a   : > { %2203 = vmatpush.bf16.msrb.mxu0 %v2942_v4 }
 0xae0   : > { %v1864_v45 = vpop.xlane.xlu1 %1863 }
 0xae1   : > { %v1865_v47 = vmul.f32 %v1864_v45, %v3630_v10 }
 0xae3   : > { %v1866_v48 = vsub.f32 %v3765_v44, %v1865_v47 }
 0xae5   : > { %v1867_v49 = vmul.f32 %v1866_v48, %v1866_v48 }
 0xae7   : > { %v1868_v37 = vsel %vm1234_vm9, %v1867_v49, 0.0 }
 0xae8   : > { %1869 = vadd.xlane.f32.xlu2 %v1868_v37 }
 0xb5b   : > { %v1870_v11 = vpop.xlane.xlu2 %1869 }
 0xb5c   : > { %v1871_v12 = vmul.f32 %v1870_v11, %v3630_v10  ;;  %v3071_v10 = vld [vmem:[%s4071_s20] ss:$0 sm:$0xff]  ;;  %s2270_s20 = sshll.u32 %s2266_s21, 4  ;;  %s2271_s20 = int_to_ptr.hbm [resolvable:$true] %s2270_s20 }
 0xb5e   : > { %v1872_v13 = vadd.f32 1e-05, %v1871_v12 }
 0xb60   : > { %3094 = vrsqrt.f32 %v1872_v13  ;;  %vm1879_vm0 = vweird.f32 %v1872_v13 }
 0xb66   : > { %v3095_v14 = vpop.eup %3094 }
 0xb67   : > { %v1874_v15 = vmul.f32 %v3095_v14, %v1872_v13  ;;  %vm1880_vm15 = vweird.f32 %v3095_v14 }
 0xb68   : > { %vm1881_vm1 = vmor %vm1879_vm0, %vm1880_vm15 }
 0xb69   : > { %v1875_v16 = vmul.f32 %v3095_v14, %v1874_v15 }
 0xb6b   : > { %v1876_v18 = vmul.f32 0.5, %v1875_v16 }
 0xb6d   : > { %v1877_v19 = vsub.f32 1.5, %v1876_v18 }
 0xb6f   : > { %v1878_v20 = vmul.f32 %v3095_v14, %v1877_v19 }
 0xb71   : > { %v1882_v23 = vsel %vm1881_vm1, %v3095_v14, %v1878_v20  ;;  %v2941_v14 = vld [vmem:[%s4073_s19 + $0x8] sm:$0xff] }
 0xb72   : > { %v1883_v17 = vmul.f32 %v1882_v23, %v1866_v48  ;;  %v2951_v48 = vld [vmem:[%s4073_s19 + $0x58] sm:$0xff]  ;;  %2204 = vmatpush.bf16.msrb.mxu0 %v2941_v14  ;;  %v2940_v23 = vld [vmem:[%s4073_s19] sm:$0xff] }
 0xb73   : > { %2215 = vmatpush.bf16.msra.mxu3 %v2951_v48 }
 0xb74   : > { %v1887_v22 = vmul.f32 %v3070_v21, %v1883_v17 }
 0xb76   : > { %v1891_v24 = vadd.f32 %v3071_v10, %v1887_v22  ;;  %2205 = vmatpush.bf16.msrb.mxu0 %v2940_v23 }
 0xb77   : > { %2216 = vmatpush.bf16.msra.mxu3 %v2950_v54 }
 0xb78   : > { %v1892_v25 = vpack.c.bf16 %v1891_v24, %v1891_v24 }
 0xb7a   : > { %2795 = vmatmul.msk.bf16.vlgmr.msrb.gmra.mxu2 %vm1234_vm9, %v1892_v25  ;;  %2796 = vmatmul.msk.bf16.vlgmr.msra.gmra.mxu1 %vm1234_vm9, %v1892_v25 }
 0xb7b   : > { %2217 = vmatpush.bf16.msra.mxu3 %v2949_v63 }
 0xb7f   : > { %2218 = vmatpush.bf16.msra.mxu3 %v2948_v9  ;;  %v3073_v9 = vld [vmem:[%s4077_s6] ss:$0 sm:$0xff]  ;;  %s3114_s6 = sshra.s32 %s2271_s20, 4  ;;  %s3115_s6 = int_to_ptr.hbm [resolvable:$true] %s3114_s6 }
 0xb80   : > { %s3116_s8 = scalar_lea.hbm %s3115_s6, 8  ;;  %p3121_p8 = scmp.lt.s32.totalorder %s3115_s6, %s4076_s0 }
 0xb81   : > { %p3117_p5 = scmp.ne.s32.totalorder %s3115_s6, %s3116_s8  ;;  %p3122_p9 = scmp.lt.s32.totalorder %s3120_s23, %s3116_s8 }
 0xb83   : > { %p3118_p6 = pnand %p3117_p5, %p3430_p10  ;;  %p3123_p11 = por %p3122_p9, %p3121_p8 }
 0xb85   : > { %p3119_p7 = pneg %p3118_p6 }
 0xb87   : > { %p3124_p13 = pnand %p3123_p11, %p3119_p7 }
 0xbf7   : > { %v1972_v31 = vpop.f32.mrf.mxu1 }
 0xbf8   : > { %v3841_v32 = vadd.f32 %v1972_v31, %v1904_v28 }
 0xbfa   : > { %v3847_v34 = vmul.f32 0.70710677, %v3841_v32 }
 0xbfc   : > { %v2020_v38 = vmul.f32 %v3847_v34, %v3847_v34 }
 0xbfd   : > { %v1959_v41 = vpop.f32.mrf.mxu2 }
 0xbfe   : > { %v3857_v42 = vmin.f32 %v2020_v38, 16.0  ;;  %v3859_v43 = vadd.f32 %v1959_v41, %v1903_v35 }
 0xbff   : > { %v1974_v39 = vpop.f32.mrf.mxu1 }
 0xc00   : > { %v2022_v45 = vmul.f32 2.1237322e-06, %v3857_v42  ;;  %v2033_v47 = vmul.f32 3.8918573e-05, %v3857_v42  ;;  %v3870_v49 = vmul.f32 0.70710677, %v3859_v43 }
 0xc01   : > { %v1976_v4 = vmul.f32 0.5, %v3859_v43 }
 0xc02   : > { %v2023_v37 = vadd.f32 0.00028619796, %v2022_v45  ;;  %v2034_v50 = vadd.f32 0.001143296, %v2033_v47  ;;  %v1980_v51 = vmul.f32 %v3870_v49, %v3870_v49 }
 0xc04   : > { %v2024_v52 = vmul.f32 %v2023_v37, %v3857_v42  ;;  %v2035_v53 = vmul.f32 %v2034_v50, %v3857_v42  ;;  %v1981_v55 = vmin.f32 %v1980_v51, 16.0 }
 0xc05   : > { %v1961_v56 = vpop.f32.mrf.mxu2 }
 0xc06   : > { %v2036_v57 = vadd.f32 0.014752088, %v2035_v53  ;;  %v2025_v59 = vadd.f32 0.0036580483, %v2024_v52  ;;  %v1982_v60 = vmul.f32 2.1237322e-06, %v1981_v55 }
 0xc07   : > { %v1993_v61 = vmul.f32 3.8918573e-05, %v1981_v55 }
 0xc08   : > { %v2037_v62 = vmul.f32 %v2036_v57, %v3857_v42  ;;  %v1983_v0 = vadd.f32 0.00028619796, %v1982_v60  ;;  %v2026_v5 = vmul.f32 %v2025_v59, %v3857_v42  ;;  %v1977_v59 = vmul.f32 0.5, %v3841_v32 }
 0xc09   : > { %v1994_v1 = vadd.f32 0.001143296, %v1993_v61 }
 0xc0a   : > { %v2038_v3 = vadd.f32 0.112945676, %v2037_v62  ;;  %v1984_v6 = vmul.f32 %v1983_v0, %v1981_v55  ;;  %v2027_v15 = vadd.f32 0.05243302, %v2026_v5 }
 0xc0b   : > { %v1995_v7 = vmul.f32 %v1994_v1, %v1981_v55 }
 0xc0c   : > { %v2039_v8 = vmul.f32 %v2038_v3, %v3857_v42  ;;  %v1985_v13 = vadd.f32 0.0036580483, %v1984_v6  ;;  %v2028_v17 = vmul.f32 %v2027_v15, %v3857_v42 }
 0xc0d   : > { %v1996_v11 = vadd.f32 0.014752088, %v1995_v7 }
 0xc0e   : > { %v2040_v12 = vadd.f32 0.4994258, %v2039_v8  ;;  %v1986_v21 = vmul.f32 %v1985_v13, %v1981_v55  ;;  %v2029_v25 = vadd.f32 0.18741608, %v2028_v17 }
 0xc0f   : > { %v1997_v16 = vmul.f32 %v1996_v11, %v1981_v55 }
 0xc10   : > { %v2041_v18 = vmul.f32 %v2040_v12, %v3857_v42  ;;  %v1987_v24 = vadd.f32 0.05243302, %v1986_v21  ;;  %v2030_v30 = vmul.f32 %v2029_v25, %v3857_v42 }
 0xc11   : > { %v1998_v19 = vadd.f32 0.112945676, %v1997_v16 }
 0xc12   : > { %v2042_v20 = vadd.f32 1.0, %v2041_v18  ;;  %v1988_v29 = vmul.f32 %v1987_v24, %v1981_v55  ;;  %v2031_v38 = vadd.f32 1.1283791, %v2030_v30 }
 0xc13   : > { %v1999_v10 = vmul.f32 %v1998_v19, %v1981_v55 }
 0xc14   : > { %3096 = vrcp.f32 %v2042_v20  ;;  %v2054_v35 = vand.u32 2147483648, %v2042_v20  ;;  %v1989_v36 = vadd.f32 0.18741608, %v1988_v29  ;;  %v2052_v41 = vand.u32 2147483647, %v2042_v20 }
 0xc15   : > { %v2000_v22 = vadd.f32 0.4994258, %v1999_v10  ;;  %vm2048_vm3 = vweird.f32 %v2042_v20  ;;  %v2032_v37 = vmul.f32 %v2031_v38, %v3847_v34 }
 0xc16   : > { %v2055_v45 = vor.u32 1.1754944e-38, %v2054_v35  ;;  %v1990_v47 = vmul.f32 %v1989_v36, %v1981_v55  ;;  %vm2053_vm5 = vcmp.eq.f32.partialorder %v2052_v41, 8.507059e+37 }
 0xc17   : > { %v2001_v26 = vmul.f32 %v2000_v22, %v1981_v55 }
 0xc18   : > { %v1991_v53 = vadd.f32 1.1283791, %v1990_v47 }
 0xc19   : > { %v2002_v27 = vadd.f32 1.0, %v2001_v26 }
 0xc1a   : > { %v3097_v28 = vpop.eup %3096  ;;  %v1992_v34 = vmul.f32 %v1991_v53, %v3870_v49  ;;  %v3072_v49 = vld [vmem:[%s4075_s22] ss:$0 sm:$0xff]  ;;  %s2254_s22 = sshll.u32 %s2250_s14, 4  ;;  %s3931_s22 = int_to_ptr.hbm [resolvable:$true] %s2254_s22 }
 0xc1b   : > { %v2044_v31 = vmul.f32 %v3097_v28, %v2042_v20  ;;  %3098 = vrcp.f32 %v2002_v27  ;;  %vm2049_vm2 = vweird.f32 %v3097_v28  ;;  %v2014_v52 = vand.u32 2147483648, %v2002_v27 }
 0xc1c   : > { %vm2050_vm4 = vmor %vm2048_vm3, %vm2049_vm2  ;;  %v2012_v56 = vand.u32 2147483647, %v2002_v27  ;;  %vm2008_vm7 = vweird.f32 %v2002_v27 }
 0xc1d   : > { %v2045_v33 = vsub.f32 1.0, %v2044_v31  ;;  %v2015_v55 = vor.u32 1.1754944e-38, %v2014_v52 }
 0xc1e   : > { %vm2013_vm10 = vcmp.eq.f32.partialorder %v2012_v56, 8.507059e+37 }
 0xc1f   : > { %v2046_v40 = vmul.f32 %v3097_v28, %v2045_v33 }
 0xc21   : > { %v3099_v46 = vpop.eup %3098  ;;  %v2047_v39 = vadd.f32 %v3097_v28, %v2046_v40 }
 0xc22   : > { %v2004_v48 = vmul.f32 %v3099_v46, %v2002_v27  ;;  %vm2009_vm6 = vweird.f32 %v3099_v46 }
 0xc23   : > { %v2051_v50 = vsel %vm2050_vm4, %v3097_v28, %v2047_v39  ;;  %vm2010_vm8 = vmor %vm2008_vm7, %vm2009_vm6 }
 0xc24   : > { %v2056_v42 = vsel %vm2053_vm5, %v2055_v45, %v2051_v50  ;;  %v2005_v2 = vsub.f32 1.0, %v2004_v48 }
 0xc25   : > { %v2057_v51 = vmul.f32 %v2056_v42, %v2032_v37 }
 0xc26   : > { %v2006_v54 = vmul.f32 %v3099_v46, %v2005_v2 }
 0xc27   : > { %v2798_v57 = vclamps-f32 %v2057_v51, 1.0 }
 0xc28   : > { %v2007_v58 = vadd.f32 %v3099_v46, %v2006_v54 }
 0xc29   : > { %v2061_v60 = vadd.f32 1.0, %v2798_v57 }
 0xc2a   : > { %v2011_v61 = vsel %vm2010_vm8, %v3099_v46, %v2007_v58 }
 0xc2b   : > { %v2063_v62 = vmul.f32 %v2061_v60, %v1977_v59  ;;  %v2016_v63 = vsel %vm2013_vm10, %v2015_v55, %v2011_v61 }
 0xc2c   : > { %v2017_v0 = vmul.f32 %v2016_v63, %v1992_v34 }
 0xc2d   : > { %v2065_v1 = vpack.c.bf16 %v2063_v62, %v2063_v62 }
 0xc2e   : > { %v2797_v3 = vclamps-f32 %v2017_v0, 1.0 }
 0xc2f   : > { %2219 = vmatmul.bf16.vlgmr.msra.gmra.mxu3 %v2065_v1 }
 0xc30   : > { %v2060_v5 = vadd.f32 1.0, %v2797_v3 }
 0xc32   : > { %v2062_v32 = vmul.f32 %v2060_v5, %v1976_v4 }
 0xc34   : > { %v2064_v6 = vpack.c.bf16 %v2062_v32, %v2062_v32 }
 0xc36   : > { %2206 = vmatmul.bf16.vlgmr.msrb.gmra.mxu0 %v2064_v6 }
 0xcb2   : > { %v2220_v7 = vpop.f32.mrf.mxu3 }
 0xcb3   : > { %v2207_v8 = vpop.f32.mrf.mxu0 }
 0xcb4   : > { %v2208_v43 = vadd.f32 %v3072_v49, %v2207_v8 }
 0xcb6   : > { %v2221_v11 = vadd.f32 %v2220_v7, %v2208_v43 }
 0xcb8   : > { %v2228_v12 = vmul.f32 %v3073_v9, %v2221_v11 }
 0xcba   : > { %v2229_v13 = vadd.f32 %v2228_v12, %v3765_v44  ;;  %2231 = vst.msk [vmem:[%s3467_s2] sm:$0xff] %vm1234_vm9, %v2228_v12  ;;  %v2222_v14 = vpop.f32.mrf.mxu3 }
 0xcbb   : > { %v2209_v15 = vpop.f32.mrf.mxu0 }
 0xcbc   : > { %3127 = shalt.err (!%p3124_p13)
}
 0xcbd   : > { %2957 = dma.vmem_to_hbm [thread:$0]  (%p3430_p10), %s2269_s9, 128, %s2271_s20, %s2238_s5   ;;  %2230 = vst.msk [vmem:[%s3465_s16] sm:$0xff] %vm1234_vm9, %v2229_v13 }
 0xcbe   : > { %s2233_s21 = scalar_lea.sflag [#allocation6], %s3453_s7  ;;  %s3142_s3 = sshra.s32 %s3931_s22, 4  ;;  %s3143_s3 = int_to_ptr.hbm [resolvable:$true] %s3142_s3 }
 0xcbf   : > { %s3144_s25 = scalar_lea.hbm %s3143_s3, 8  ;;  %s3148_s8 = scalar_lea.hbm %s4079_s29, 32 }
 0xcc0   : > { %p3145_p0 = scmp.ne.s32.totalorder %s3143_s3, %s3144_s25  ;;  %p3149_p3 = scmp.lt.s32.totalorder %s3143_s3, %s4079_s29 }
 0xcc1   : > { %p3150_p4 = scmp.lt.s32.totalorder %s3148_s8, %s3144_s25 }
 0xcc2   : > { %p3146_p1 = pnand %p3145_p0, %p3430_p10 }
 0xcc3   : > { %p3151_p5 = por %p3150_p4, %p3149_p3 }
 0xcc4   : > { %p3147_p2 = pneg %p3146_p1 }
 0xcc6   : > { %p3152_p6 = pnand %p3151_p5, %p3147_p2 }
 0xcc8   : > { %3155 = shalt.err (!%p3152_p6)
}
 0xcc9   : > { %2956 = dma.vmem_to_hbm [thread:$0]  (%p3430_p10), %s3929_s27, 128, %s3931_s22, %s2233_s21  }
 0xcca PF: > { %p2967_p7 = scmp.ge.s32.totalorder %s3242_s28, 2  ;;  %s2282_s9 = sand.u32 1, %s3206_s1  }
 0xccb   : > { %s2283_s16 = scalar_lea.sflag [#allocation6], %s2282_s9 }
 0xccc   : > { %p2961_p8 = pnand %p2967_p7, %p3437_p12 }
 0xcce   : > { %p2962_p9 = pneg %p2961_p8 }
 0xcd0   : > { %3197 = dma.done.wait (%p2962_p9), %s2283_s16, 128  }
 0xcd1   : > { %3199 = vsyncadd (%p2962_p9), %s2283_s16, 4294967168  ;;  %s2293_s7 = scalar_lea.sflag [#allocation8], %s2282_s9 }
 0xcd2   : > { %3201 = dma.done.wait (%p2962_p9), %s2293_s7, 128  }
 0xcd3   : > { %3203 = vsyncadd (%p2962_p9), %s2293_s7, 4294967168  ;;  %s37_s28 = sadd.s32 1, %s3242_s28   ;;  %s4080_s1 = sld [smem:[#allocation11_spill]] }
 0xcd4   : > { %p34_p11 = scmp.ge.s32.totalorder %s37_s28, 6   ;;  %s4081_s22 = sld [smem:[#allocation12_spill]] }
 0xcd5   : > { %s4082_s23 = sld [smem:[#allocation19_spill]] }
 0xcd6   : > { %s4083_s24 = sld [smem:[#allocation13_spill]] }
 0xcd7   : > { %s4084_s2 = sld [smem:[#allocation18_spill]]  ;;  %36 = sbr.rel (!%p34_p11) target bundleno = 26 (0x1a), region = 232 }
 0xcd8   : > { %s4085_s25 = sld [smem:[#allocation14_spill]] }
 0xcd9   : > { %s4086_s3 = sld [smem:[#allocation15_spill]] }
 0xcda   : > { %s4087_s26 = sld [smem:[#allocation16_spill]] }
 0xcdb   : > { %s4088_s27 = sld [smem:[#allocation17_spill]] }
 0xcdc   :  { %2299 = vsyncpa [#allocation6], 1 }
 0xcdd   :  { %2301 = vsyncpa [#allocation6 + $0x1], 1 }
 0xcde   :  { %2302 = vsyncpa [#allocation8], 1 }
 0xcdf   :  { %2304 = vsyncpa [#allocation8 + $0x1], 1 }

</bundles_post_ra>
